<compile_context>
chip_gen: v6e
topology: v6e:2x2x1
jax: 0.10.0
libtpu: 0.0.40
codegen_flags: <defaults>
</compile_context>

<pallas_src>
import functools

import jax
import jax.numpy as jnp
from jax.experimental import pallas as pl
from jax.experimental.pallas import tpu as pltpu

_LN_EPS = 1e-5
_VMEM_LIMIT_CACHE = None


def _vmem_limit():
    """Generation-aware scoped-VMEM cap: ~100 MiB on v5e/v6e, ~48 MiB on v7x."""
    global _VMEM_LIMIT_CACHE
    if _VMEM_LIMIT_CACHE is None:
        try:
            cap = int(pltpu.get_tpu_info().vmem_capacity_bytes)
        except Exception:   # conservative fallback if the query is unavailable
            cap = 64 * 1024 * 1024
        _VMEM_LIMIT_CACHE = int(min(100 << 20, max(32 << 20, cap - (16 << 20))))
    return _VMEM_LIMIT_CACHE


def _pick_tile(dim, target, align):
    """Largest `align`-aligned divisor of `dim` that is <= target; else full dim."""
    if dim <= target:
        return dim
    t = (target // align) * align
    while t >= align:
        if dim % t == 0:
            return t
        t -= align
    return dim


def _ln(x, g, b):
    mu = jnp.mean(x, axis=-1, keepdims=True)
    var = jnp.mean(jnp.square(x - mu), axis=-1, keepdims=True)
    return (x - mu) * jax.lax.rsqrt(var + _LN_EPS) * g + b


# ---------------------------------------------------------------------------
# Kernel 1: tiled bf16-operand matmul (patch embedding)
# ---------------------------------------------------------------------------

def _matmul_kernel_acc(x_ref, w_ref, b_ref, o_ref, acc_ref):
    @pl.when(pl.program_id(2) == 0)
    def _():
        acc_ref[...] = jnp.zeros_like(acc_ref)

    acc_ref[...] += jnp.dot(x_ref[...].astype(jnp.bfloat16),
                            w_ref[...].astype(jnp.bfloat16),
                            preferred_element_type=jnp.float32)

    @pl.when(pl.program_id(2) == pl.num_programs(2) - 1)
    def _():
        o_ref[...] = (acc_ref[...] + b_ref[...]).astype(o_ref.dtype)


def _matmul_kernel_simple(x_ref, w_ref, b_ref, o_ref):
    o_ref[...] = (jnp.dot(x_ref[...].astype(jnp.bfloat16),
                          w_ref[...].astype(jnp.bfloat16),
                          preferred_element_type=jnp.float32)
                  + b_ref[...]).astype(o_ref.dtype)


def tiled_linear(x, w, b):
    M, K = x.shape
    K2, N = w.shape
    assert K == K2
    big_vmem = _vmem_limit() >= (96 << 20)
    tgt = 1024 if big_vmem else 512
    tm = _pick_tile(M, tgt, 8)
    tn = _pick_tile(N, tgt, 128)
    tk = _pick_tile(K, 512, 128)
    flops = 2 * M * N * K
    bytes_accessed = int(x.size * x.dtype.itemsize + w.size * w.dtype.itemsize
                         + 4 * M * N + 4 * N)

    if tk == K:
        # Single K tile: no accumulator scratch, no reduction grid axis.
        return pl.pallas_call(
            _matmul_kernel_simple,
            out_shape=jax.ShapeDtypeStruct((M, N), jnp.float32),
            grid=(M // tm, N // tn),
            in_specs=[pl.BlockSpec((tm, K), lambda i, j: (i, 0)),
                      pl.BlockSpec((K, tn), lambda i, j: (0, j)),
                      pl.BlockSpec((1, tn), lambda i, j: (0, j))],
            out_specs=pl.BlockSpec((tm, tn), lambda i, j: (i, j)),
            compiler_params=pltpu.CompilerParams(
                dimension_semantics=("parallel", "parallel"),
                vmem_limit_bytes=_vmem_limit()),
            cost_estimate=pl.CostEstimate(flops=flops, transcendentals=0,
                                          bytes_accessed=bytes_accessed),
        )(x, w, b.reshape(1, N))

    return pl.pallas_call(
        _matmul_kernel_acc,
        out_shape=jax.ShapeDtypeStruct((M, N), jnp.float32),
        grid=(M // tm, N // tn, K // tk),
        in_specs=[pl.BlockSpec((tm, tk), lambda i, j, k: (i, k)),
                  pl.BlockSpec((tk, tn), lambda i, j, k: (k, j)),
                  pl.BlockSpec((1, tn), lambda i, j, k: (0, j))],
        out_specs=pl.BlockSpec((tm, tn), lambda i, j, k: (i, j)),
        scratch_shapes=[pltpu.VMEM((tm, tn), jnp.float32)],
        compiler_params=pltpu.CompilerParams(
            dimension_semantics=("parallel", "parallel", "arbitrary"),
            vmem_limit_bytes=_vmem_limit()),
        cost_estimate=pl.CostEstimate(flops=flops, transcendentals=0,
                                      bytes_accessed=bytes_accessed),
    )(x, w, b.reshape(1, N))


# ---------------------------------------------------------------------------
# Kernel 2: ALL transformer blocks fused in one pallas_call
#   grid = (B "parallel", num_layers "arbitrary"); residual resident in VMEM.
# ---------------------------------------------------------------------------

def _stack_kernel(x_ref, ln1g_ref, ln1b_ref, wqkv_ref, bqkv_ref, wo_ref, bo_ref,
                  ln2g_ref, ln2b_ref, w1_ref, b1_ref, w2_ref, b2_ref,
                  o_ref, res_ref, *, num_heads):
    l = pl.program_id(1)

    # Load the fresh residual stream from HBM only on the first layer.
    @pl.when(l == 0)
    def _():
        res_ref[...] = x_ref[0].astype(jnp.float32)

    x = res_ref[...]                                  # (S, D) residual, f32
    S, D = x.shape
    Dh = D // num_heads
    scale = 1.0 / (Dh ** 0.5)

    # --- attention: LN1 -> fused QKV -> batched-head causal softmax -> out proj
    h = _ln(x, ln1g_ref[0], ln1b_ref[0])
    qkv = jnp.dot(h.astype(jnp.bfloat16), wqkv_ref[0].astype(jnp.bfloat16),
                  preferred_element_type=jnp.float32) + bqkv_ref[0]     # (S, 3D)

    def split_heads(off):
        # (S, D) slab -> (H, S, Dh) leading-batch layout for batched MXU matmuls
        return jnp.stack([qkv[:, off + hh * Dh: off + (hh + 1) * Dh]
                          for hh in range(num_heads)], axis=0)

    q = split_heads(0) * scale                        # scale folded into q
    k = split_heads(D)
    v = split_heads(2 * D)

    row = jax.lax.broadcasted_iota(jnp.int32, (S, S), 0)
    col = jax.lax.broadcasted_iota(jnp.int32, (S, S), 1)
    mask_add = jnp.where(col <= row, jnp.float32(0.0), jnp.float32(-1e30))

    # One batched MXU matmul over all heads (H as the leading batch dim).
    s = jax.lax.dot_general(q.astype(jnp.bfloat16), k.astype(jnp.bfloat16),
                            (((2,), (2,)), ((0,), (0,))),
                            preferred_element_type=jnp.float32)         # (H, S, S)
    s = s + mask_add[None, :, :]
    m = jnp.max(s, axis=-1, keepdims=True)
    p = jnp.exp(s - m)
    p = p * pl.reciprocal(jnp.sum(p, axis=-1, keepdims=True), approx=True)
    o = jax.lax.dot_general(p.astype(jnp.bfloat16), v.astype(jnp.bfloat16),
                            (((2,), (1,)), ((0,), (0,))),
                            preferred_element_type=jnp.float32)         # (H, S, Dh)
    attn = jnp.concatenate([o[hh] for hh in range(num_heads)], axis=-1)  # (S, D)

    x = x + (jnp.dot(attn.astype(jnp.bfloat16), wo_ref[0].astype(jnp.bfloat16),
                     preferred_element_type=jnp.float32) + bo_ref[0])

    # --- MLP: LN2 -> up (GELU) -> down -> +res
    h2 = _ln(x, ln2g_ref[0], ln2b_ref[0])
    m1 = jnp.dot(h2.astype(jnp.bfloat16), w1_ref[0].astype(jnp.bfloat16),
                 preferred_element_type=jnp.float32) + b1_ref[0]
    m1 = jax.nn.gelu(m1)                              # f32 VPU/EUP (tanh approx)
    x = x + (jnp.dot(m1.astype(jnp.bfloat16), w2_ref[0].astype(jnp.bfloat16),
                     preferred_element_type=jnp.float32) + b2_ref[0])

    res_ref[...] = x                                  # carry to next layer

    @pl.when(l == pl.num_programs(1) - 1)
    def _():
        o_ref[0] = x.astype(o_ref.dtype)              # flushed when b advances


def transformer_stack_fused(x, blk, num_heads):
    B, S, D = x.shape
    NL = blk['wqkv'].shape[0]
    dff = blk['w1'].shape[2]

    def wspec(*shape):
        n = len(shape)
        return pl.BlockSpec((1,) + shape, lambda b, l, n=n: (l,) + (0,) * n)

    kernel = functools.partial(_stack_kernel, num_heads=num_heads)
    return pl.pallas_call(
        kernel,
        out_shape=jax.ShapeDtypeStruct((B, S, D), jnp.float32),
        grid=(B, NL),
        in_specs=[pl.BlockSpec((1, S, D), lambda b, l: (b, 0, 0)),
                  wspec(1, D), wspec(1, D),
                  wspec(D, 3 * D), wspec(1, 3 * D),
                  wspec(D, D), wspec(1, D),
                  wspec(1, D), wspec(1, D),
                  wspec(D, dff), wspec(1, dff),
                  wspec(dff, D), wspec(1, D)],
        out_specs=pl.BlockSpec((1, S, D), lambda b, l: (b, 0, 0)),
        scratch_shapes=[pltpu.VMEM((S, D), jnp.float32)],   # resident residual
        input_output_aliases={0: 0},
        compiler_params=pltpu.CompilerParams(
            dimension_semantics=("parallel", "arbitrary"),
            vmem_limit_bytes=_vmem_limit()),
    )(x, blk['ln1_g'], blk['ln1_b'], blk['wqkv'], blk['bqkv'],
      blk['wo'], blk['bo'], blk['ln2_g'], blk['ln2_b'],
      blk['w1'], blk['b1'], blk['w2'], blk['b2'])


# ---------------------------------------------------------------------------
# Kernel 3: fused final LayerNorm + lm_head (lane-padded) + per-tile MSE sums
# ---------------------------------------------------------------------------

def _head_loss_kernel(x_ref, g_ref, b_ref, w_ref, wb_ref, t_ref,
                      logits_ref, psum_ref):
    x = x_ref[...].astype(jnp.float32)
    h = _ln(x, g_ref[...], b_ref[...])
    logits = jnp.dot(h.astype(jnp.bfloat16), w_ref[...].astype(jnp.bfloat16),
                     preferred_element_type=jnp.float32) + wb_ref[...]
    logits_ref[...] = logits.astype(logits_ref.dtype)

    d = logits - t_ref[...].astype(jnp.float32)      # padded cols are exactly 0-0
    psum_ref[0, 0] = jnp.sum(d * d)                  # per-tile partial sum


def head_and_loss(x, g, b, w_pad, b_pad, tgt_pad, patch_dim):
    M, D = x.shape
    Np = w_pad.shape[1]
    big_vmem = _vmem_limit() >= (96 << 20)
    tm = _pick_tile(M, 1024 if big_vmem else 512, 8)
    ntiles = M // tm
    logits, psums = pl.pallas_call(
        _head_loss_kernel,
        out_shape=(jax.ShapeDtypeStruct((M, Np), jnp.float32),
                   jax.ShapeDtypeStruct((ntiles, 1), jnp.float32)),
        grid=(ntiles,),
        in_specs=[pl.BlockSpec((tm, D), lambda i: (i, 0)),
                  pl.BlockSpec((1, D), lambda i: (0, 0)),
                  pl.BlockSpec((1, D), lambda i: (0, 0)),
                  pl.BlockSpec((D, Np), lambda i: (0, 0)),
                  pl.BlockSpec((1, Np), lambda i: (0, 0)),
                  pl.BlockSpec((tm, Np), lambda i: (i, 0))],
        out_specs=(pl.BlockSpec((tm, Np), lambda i: (i, 0)),
                   pl.BlockSpec((1, 1), lambda i: (i, 0),
                                memory_space=pltpu.SMEM)),
        compiler_params=pltpu.CompilerParams(
            dimension_semantics=("parallel",),       # tiles shard across cores
            vmem_limit_bytes=_vmem_limit()),
    )(x, g.reshape(1, D), b.reshape(1, D), w_pad, b_pad.reshape(1, Np), tgt_pad)
    loss = jnp.sum(psums) / jnp.float32(M * patch_dim)
    return logits, loss


# ---------------------------------------------------------------------------
# Plain-JAX glue (layout only: patch extraction, SOS concat, pos add, padding)
# ---------------------------------------------------------------------------

def patchify(imgs, p):
    # Matches CGPTARModel.patchify: per-patch element order (p, p, C).
    B, C, H, W = imgs.shape
    h, w = H // p, W // p
    x = imgs.reshape(B, C, h, p, w, p)
    x = x.transpose(0, 2, 4, 3, 5, 1)                # (B, h, w, p, p, C)
    return x.reshape(B, h * w, p * p * C)


def extract_conv_patches(imgs, p):
    # Conv2d(kernel=p, stride=p) equivalent: per-patch element order (C, p, p).
    B, C, H, W = imgs.shape
    h, w = H // p, W // p
    x = imgs.reshape(B, C, h, p, w, p)
    x = x.transpose(0, 2, 4, 1, 3, 5)                # (B, h, w, C, p, p)
    return x.reshape(B, h * w, C * p * p)


def cgpt_ar_forward(inputs, params, *, patch_size, num_heads):
    """labels=None path of CGPTARModel.forward: returns (mse_loss, logits)."""
    B, C, H, W = inputs.shape
    p = patch_size
    D = params['pos_emb'].shape[1]

    x_patches = patchify(inputs, p)                      # (B, L, p*p*C)  targets
    conv_patches = extract_conv_patches(inputs, p)       # (B, L, C*p*p)
    L = conv_patches.shape[1]
    assert L < params['pos_emb'].shape[0]                # mirrors T < max_seqlen
    S = L + 1

    # patch embedding (conv as matmul); bf16 activations halve HBM traffic and
    # the kernel casts operands to bf16 anyway (identical numerics).
    emb = tiled_linear(conv_patches.reshape(B * L, -1).astype(jnp.bfloat16),
                       params['conv_w'], params['conv_b']).reshape(B, L, D)

    # SOS token + positional embedding, dropout == identity (inference)
    sos = jnp.broadcast_to(params['sos'], (B, 1, D))
    x = jnp.concatenate([sos, emb], axis=1)              # (B, S, D)
    x = x + params['pos_emb'][:S][None, :, :]

    # All transformer blocks in ONE pallas_call (residual resident in VMEM).
    x = transformer_stack_fused(x, params['blocks'], num_heads)

    # labels is None branch: drop last token, ln_f + lm_head + MSE fused.
    xd = x[:, :-1, :].reshape(B * L, D)
    tgt = x_patches.reshape(B * L, -1)
    patch_dim = tgt.shape[-1]
    Np = ((patch_dim + 127) // 128) * 128                # lane-dense output
    tgt_pad = jnp.pad(tgt, ((0, 0), (0, Np - patch_dim)))
    lm_w_pad = jnp.pad(params['lm_w'], ((0, 0), (0, Np - patch_dim)))
    lm_b_pad = jnp.pad(params['lm_b'], (0, Np - patch_dim))

    logits_pad, loss = head_and_loss(xd, params['lnf_g'], params['lnf_b'],
                                     lm_w_pad, lm_b_pad, tgt_pad, patch_dim)
    logits = logits_pad[:, :patch_dim].reshape(B, L, patch_dim)
    return loss, logits


def init_params(key, *, in_chans, patch_size, embed_dim, num_layers, mlp_ratio,
                num_patches):
    d_ff = int(mlp_ratio * embed_dim)
    patch_dim = patch_size * patch_size * in_chans
    max_seqlen = num_patches + 1
    D, NL = embed_dim, num_layers
    keys = jax.random.split(key, 4 + num_layers)
    wdt = jnp.bfloat16   # matmul weights stored in bf16 (f32 MXU accumulation)

    def nrm(k, shape, std=0.02, dtype=jnp.float32):
        return (std * jax.random.normal(k, shape, dtype=jnp.float32)).astype(dtype)

    params = {
        'conv_w': nrm(keys[0], (in_chans * patch_size * patch_size, D), dtype=wdt),
        'conv_b': jnp.zeros((D,), jnp.float32),
        'sos': jax.random.normal(keys[1], (1, 1, D), dtype=jnp.float32),
        'pos_emb': nrm(keys[2], (max_seqlen, D)),
        'lnf_g': jnp.ones((D,), jnp.float32),
        'lnf_b': jnp.zeros((D,), jnp.float32),
        'lm_w': nrm(keys[3], (D, patch_dim), dtype=wdt),
        'lm_b': jnp.zeros((patch_dim,), jnp.float32),
    }
    wqkv, wo, w1, w2 = [], [], [], []
    for l in range(num_layers):
        bk = jax.random.split(keys[4 + l], 6)
        wq = nrm(bk[0], (D, D))
        wk = nrm(bk[1], (D, D))
        wv = nrm(bk[2], (D, D))
        wqkv.append(jnp.concatenate([wq, wk, wv], axis=1).astype(wdt))
        wo.append(nrm(bk[3], (D, D), dtype=wdt))
        w1.append(nrm(bk[4], (D, d_ff), dtype=wdt))
        w2.append(nrm(bk[5], (d_ff, D), dtype=wdt))
    # Per-layer weights stacked along a leading layer axis for the fused kernel.
    params['blocks'] = {
        'ln1_g': jnp.ones((NL, 1, D), jnp.float32),
        'ln1_b': jnp.zeros((NL, 1, D), jnp.float32),
        'ln2_g': jnp.ones((NL, 1, D), jnp.float32),
        'ln2_b': jnp.zeros((NL, 1, D), jnp.float32),
        'wqkv': jnp.stack(wqkv, axis=0),
        'bqkv': jnp.zeros((NL, 1, 3 * D), jnp.float32),
        'wo': jnp.stack(wo, axis=0),
        'bo': jnp.zeros((NL, 1, D), jnp.float32),
        'w1': jnp.stack(w1, axis=0),
        'b1': jnp.zeros((NL, 1, d_ff), jnp.float32),
        'w2': jnp.stack(w2, axis=0),
        'b2': jnp.zeros((NL, 1, D), jnp.float32),
    }
    return params


if __name__ == "__main__":
    # Small shapes consistent with the module: 16x16 input, patch 4 -> 16 patches.
    # D (and hence 3D, dff) chosen as a multiple of 128 so every kernel store is
    # lane-dense (unmasked vst on v5e).
    B, C, HW, P = 2, 3, 16, 4
    D, HEADS, LAYERS, MLP = 128, 4, 2, 4.0
    num_patches = (HW // P) * (HW // P)

    key = jax.random.PRNGKey(0)
    pkey, xkey = jax.random.split(key)
    params = init_params(pkey, in_chans=C, patch_size=P, embed_dim=D,
                         num_layers=LAYERS, mlp_ratio=MLP, num_patches=num_patches)
    inputs = jax.random.normal(xkey, (B, C, HW, HW), dtype=jnp.float32)

    fwd = jax.jit(functools.partial(cgpt_ar_forward, patch_size=P, num_heads=HEADS))
    loss, logits = fwd(inputs, params)
    jax.block_until_ready((loss, logits))

    assert logits.shape == (B, num_patches, P * P * C), logits.shape
    assert bool(jnp.isfinite(loss)), loss
    assert bool(jnp.all(jnp.isfinite(logits)))
    print("KERNEL_OK")
</pallas_src>

<mosaic_0001>
module attributes {stable_mosaic.version = 11 : i64} {
  func.func @_matmul_kernel_simple(%arg0: i32, %arg1: i32, %arg2: memref<32x48xbf16, #tpu.memory_space<vmem>>, %arg3: memref<48x128xbf16, #tpu.memory_space<vmem>>, %arg4: memref<1x128xf32, #tpu.memory_space<vmem>>, %arg5: memref<32x128xf32, #tpu.memory_space<vmem>>) attributes {dimension_semantics = [#tpu.dimension_semantics<parallel>, #tpu.dimension_semantics<parallel>], iteration_bounds = array<i64: 1, 1>, scalar_prefetch = 0 : i64, scratch_operands = 0 : i64, tpu.core_type = #tpu.core_type<tc>, window_params = [{transform_indices = @transform_0, window_bounds = array<i64: 32, 48>}, {transform_indices = @transform_1, window_bounds = array<i64: 48, 128>}, {transform_indices = @transform_2, window_bounds = array<i64: 1, 128>}, {transform_indices = @transform_3, window_bounds = array<i64: 32, 128>}]} {
    %c0 = arith.constant 0 : index
    %c0_0 = arith.constant 0 : index
    %0 = vector.load %arg2[%c0, %c0_0] : memref<32x48xbf16, #tpu.memory_space<vmem>>, vector<32x48xbf16>
    %c0_1 = arith.constant 0 : index
    %c0_2 = arith.constant 0 : index
    %1 = vector.load %arg3[%c0_1, %c0_2] : memref<48x128xbf16, #tpu.memory_space<vmem>>, vector<48x128xbf16>
    %cst = arith.constant dense<0.000000e+00> : vector<32x128xf32>
    %2 = tpu.matmul %0, %1, %cst {dimension_numbers = #tpu.dot_dimension_numbers<[1], [0], [0], [1], [0, 0, 1, 1], [], []>} : vector<32x48xbf16>, vector<48x128xbf16>, vector<32x128xf32> -> vector<32x128xf32>
    %c0_3 = arith.constant 0 : index
    %c0_4 = arith.constant 0 : index
    %3 = vector.load %arg4[%c0_3, %c0_4] : memref<1x128xf32, #tpu.memory_space<vmem>>, vector<1x128xf32>
    %4 = vector.broadcast %3 : vector<1x128xf32> to vector<32x128xf32>
    %5 = arith.addf %2, %4 : vector<32x128xf32>
    %c0_5 = arith.constant 0 : index
    %c0_6 = arith.constant 0 : index
    %6 = vector.load %arg5[%c0_5, %c0_6] : memref<32x128xf32, #tpu.memory_space<vmem>>, vector<32x128xf32>
    tpu.vector_store %arg5[%c0_5, %c0_6], %5 {strides = array<i32>} : memref<32x128xf32, #tpu.memory_space<vmem>>, vector<32x128xf32>,
    return
  }
  func.func @transform_0(%arg0: i32, %arg1: i32) -> (i32, i32) {
    %c0_i32 = arith.constant 0 : i32
    %c0_i32_0 = arith.constant 0 : i32
    return %arg0, %c0_i32 : i32, i32
  }
  func.func @transform_1(%arg0: i32, %arg1: i32) -> (i32, i32) {
    %c0_i32 = arith.constant 0 : i32
    %c0_i32_0 = arith.constant 0 : i32
    return %c0_i32, %arg1 : i32, i32
  }
  func.func @transform_2(%arg0: i32, %arg1: i32) -> (i32, i32) {
    %c0_i32 = arith.constant 0 : i32
    %c0_i32_0 = arith.constant 0 : i32
    return %c0_i32, %arg1 : i32, i32
  }
  func.func @transform_3(%arg0: i32, %arg1: i32) -> (i32, i32) {
    %c0_i32 = arith.constant 0 : i32
    return %arg0, %arg1 : i32, i32
  }
}

module attributes {stable_mosaic.version = 11 : i64} {
  func.func @_stack_kernel(%arg0: i32, %arg1: i32, %arg2: memref<1x17x128xf32, #tpu.memory_space<vmem>>, %arg3: memref<1x1x128xf32, #tpu.memory_space<vmem>>, %arg4: memref<1x1x128xf32, #tpu.memory_space<vmem>>, %arg5: memref<1x128x384xbf16, #tpu.memory_space<vmem>>, %arg6: memref<1x1x384xf32, #tpu.memory_space<vmem>>, %arg7: memref<1x128x128xbf16, #tpu.memory_space<vmem>>, %arg8: memref<1x1x128xf32, #tpu.memory_space<vmem>>, %arg9: memref<1x1x128xf32, #tpu.memory_space<vmem>>, %arg10: memref<1x1x128xf32, #tpu.memory_space<vmem>>, %arg11: memref<1x128x512xbf16, #tpu.memory_space<vmem>>, %arg12: memref<1x1x512xf32, #tpu.memory_space<vmem>>, %arg13: memref<1x512x128xbf16, #tpu.memory_space<vmem>>, %arg14: memref<1x1x128xf32, #tpu.memory_space<vmem>>, %arg15: memref<1x17x128xf32, #tpu.memory_space<vmem>>, %arg16: memref<17x128xf32, #tpu.memory_space<vmem>>) attributes {dimension_semantics = [#tpu.dimension_semantics<parallel>, #tpu.dimension_semantics<arbitrary>], iteration_bounds = array<i64: 2, 2>, scalar_prefetch = 0 : i64, scratch_operands = 1 : i64, tpu.core_type = #tpu.core_type<tc>, window_params = [{transform_indices = @transform_0, window_bounds = array<i64: 1, 17, 128>}, {transform_indices = @transform_1, window_bounds = array<i64: 1, 1, 128>}, {transform_indices = @transform_2, window_bounds = array<i64: 1, 1, 128>}, {transform_indices = @transform_3, window_bounds = array<i64: 1, 128, 384>}, {transform_indices = @transform_4, window_bounds = array<i64: 1, 1, 384>}, {transform_indices = @transform_5, window_bounds = array<i64: 1, 128, 128>}, {transform_indices = @transform_6, window_bounds = array<i64: 1, 1, 128>}, {transform_indices = @transform_7, window_bounds = array<i64: 1, 1, 128>}, {transform_indices = @transform_8, window_bounds = array<i64: 1, 1, 128>}, {transform_indices = @transform_9, window_bounds = array<i64: 1, 128, 512>}, {transform_indices = @transform_10, window_bounds = array<i64: 1, 1, 512>}, {transform_indices = @transform_11, window_bounds = array<i64: 1, 512, 128>}, {transform_indices = @transform_12, window_bounds = array<i64: 1, 1, 128>}, {transform_indices = @transform_13, window_bounds = array<i64: 1, 17, 128>}]} {
    %c0_i32 = arith.constant 0 : i32
    %0 = arith.cmpi eq, %arg1, %c0_i32 : i32
    %1 = arith.extui %0 : i1 to i32
    %c0_i32_0 = arith.constant 0 : i32
    %2 = arith.cmpi ne, %1, %c0_i32_0 : i32
    scf.if %2 {
      %c0_65 = arith.constant 0 : index
      %c0_66 = arith.constant 0 : index
      %c0_67 = arith.constant 0 : index
      %170 = vector.load %arg2[%c0_65, %c0_66, %c0_67] : memref<1x17x128xf32, #tpu.memory_space<vmem>>, vector<1x17x128xf32>
      %171 = vector.shape_cast %170 : vector<1x17x128xf32> to vector<17x128xf32>
      %c0_68 = arith.constant 0 : index
      %c0_69 = arith.constant 0 : index
      %172 = vector.load %arg16[%c0_68, %c0_69] : memref<17x128xf32, #tpu.memory_space<vmem>>, vector<17x128xf32>
      tpu.vector_store %arg16[%c0_68, %c0_69], %171 {strides = array<i32>} : memref<17x128xf32, #tpu.memory_space<vmem>>, vector<17x128xf32>,
    } else {
    }
    %c0 = arith.constant 0 : index
    %c0_1 = arith.constant 0 : index
    %3 = vector.load %arg16[%c0, %c0_1] : memref<17x128xf32, #tpu.memory_space<vmem>>, vector<17x128xf32>
    %c0_2 = arith.constant 0 : index
    %c0_3 = arith.constant 0 : index
    %c0_4 = arith.constant 0 : index
    %4 = vector.load %arg3[%c0_2, %c0_3, %c0_4] : memref<1x1x128xf32, #tpu.memory_space<vmem>>, vector<1x1x128xf32>
    %5 = vector.shape_cast %4 : vector<1x1x128xf32> to vector<1x128xf32>
    %c0_5 = arith.constant 0 : index
    %c0_6 = arith.constant 0 : index
    %c0_7 = arith.constant 0 : index
    %6 = vector.load %arg4[%c0_5, %c0_6, %c0_7] : memref<1x1x128xf32, #tpu.memory_space<vmem>>, vector<1x1x128xf32>
    %7 = vector.shape_cast %6 : vector<1x1x128xf32> to vector<1x128xf32>
    %cst = arith.constant dense<0.000000e+00> : vector<17xf32>
    %8 = vector.multi_reduction <add>, %3, %cst [1] : vector<17x128xf32> to vector<17xf32>
    %9 = vector.shape_cast %8 : vector<17xf32> to vector<17x1xf32>
    %cst_8 = arith.constant 1.280000e+02 : f32
    %10 = vector.broadcast %cst_8 : f32 to vector<17x1xf32>
    %11 = arith.divf %9, %10 : vector<17x1xf32>
    %12 = vector.broadcast %11 : vector<17x1xf32> to vector<17x128xf32>
    %13 = arith.subf %3, %12 : vector<17x128xf32>
    %14 = arith.mulf %13, %13 : vector<17x128xf32>
    %cst_9 = arith.constant dense<0.000000e+00> : vector<17xf32>
    %15 = vector.multi_reduction <add>, %14, %cst_9 [1] : vector<17x128xf32> to vector<17xf32>
    %16 = vector.shape_cast %15 : vector<17xf32> to vector<17x1xf32>
    %cst_10 = arith.constant 1.280000e+02 : f32
    %17 = vector.broadcast %cst_10 : f32 to vector<17x1xf32>
    %18 = arith.divf %16, %17 : vector<17x1xf32>
    %19 = vector.broadcast %11 : vector<17x1xf32> to vector<17x128xf32>
    %20 = arith.subf %3, %19 : vector<17x128xf32>
    %cst_11 = arith.constant 9.99999974E-6 : f32
    %21 = vector.broadcast %cst_11 : f32 to vector<17x1xf32>
    %22 = arith.addf %18, %21 : vector<17x1xf32>
    %23 = math.rsqrt %22 : vector<17x1xf32>
    %24 = vector.broadcast %23 : vector<17x1xf32> to vector<17x128xf32>
    %25 = arith.mulf %20, %24 : vector<17x128xf32>
    %26 = vector.broadcast %5 : vector<1x128xf32> to vector<17x128xf32>
    %27 = arith.mulf %25, %26 : vector<17x128xf32>
    %28 = vector.broadcast %7 : vector<1x128xf32> to vector<17x128xf32>
    %29 = arith.addf %27, %28 : vector<17x128xf32>
    %30 = arith.truncf %29 : vector<17x128xf32> to vector<17x128xbf16>
    %c0_12 = arith.constant 0 : index
    %c0_13 = arith.constant 0 : index
    %c0_14 = arith.constant 0 : index
    %31 = vector.load %arg5[%c0_12, %c0_13, %c0_14] : memref<1x128x384xbf16, #tpu.memory_space<vmem>>, vector<1x128x384xbf16>
    %32 = vector.shape_cast %31 : vector<1x128x384xbf16> to vector<128x384xbf16>
    %cst_15 = arith.constant dense<0.000000e+00> : vector<17x384xf32>
    %33 = tpu.matmul %30, %32, %cst_15 {dimension_numbers = #tpu.dot_dimension_numbers<[1], [0], [0], [1], [0, 0, 1, 1], [], []>} : vector<17x128xbf16>, vector<128x384xbf16>, vector<17x384xf32> -> vector<17x384xf32>
    %c0_16 = arith.constant 0 : index
    %c0_17 = arith.constant 0 : index
    %c0_18 = arith.constant 0 : index
    %34 = vector.load %arg6[%c0_16, %c0_17, %c0_18] : memref<1x1x384xf32, #tpu.memory_space<vmem>>, vector<1x1x384xf32>
    %35 = vector.shape_cast %34 : vector<1x1x384xf32> to vector<1x384xf32>
    %36 = vector.broadcast %35 : vector<1x384xf32> to vector<17x384xf32>
    %37 = arith.addf %33, %36 : vector<17x384xf32>
    %38 = vector.extract_strided_slice %37 {offsets = [0, 0], sizes = [17, 32], strides = [1, 1]} : vector<17x384xf32> to vector<17x32xf32>
    %39 = vector.extract_strided_slice %37 {offsets = [0, 32], sizes = [17, 32], strides = [1, 1]} : vector<17x384xf32> to vector<17x32xf32>
    %40 = vector.extract_strided_slice %37 {offsets = [0, 64], sizes = [17, 32], strides = [1, 1]} : vector<17x384xf32> to vector<17x32xf32>
    %41 = vector.extract_strided_slice %37 {offsets = [0, 96], sizes = [17, 32], strides = [1, 1]} : vector<17x384xf32> to vector<17x32xf32>
    %42 = vector.shape_cast %38 : vector<17x32xf32> to vector<1x17x32xf32>
    %43 = vector.shape_cast %39 : vector<17x32xf32> to vector<1x17x32xf32>
    %44 = vector.shape_cast %40 : vector<17x32xf32> to vector<1x17x32xf32>
    %45 = vector.shape_cast %41 : vector<17x32xf32> to vector<1x17x32xf32>
    %46 = tpu.concatenate %42, %43, %44, %45 in 0 : vector<1x17x32xf32>, vector<1x17x32xf32>, vector<1x17x32xf32>, vector<1x17x32xf32> -> vector<4x17x32xf32>
    %cst_19 = arith.constant 0.176776692 : f32
    %47 = vector.broadcast %cst_19 : f32 to vector<4x17x32xf32>
    %48 = arith.mulf %46, %47 : vector<4x17x32xf32>
    %49 = vector.extract_strided_slice %37 {offsets = [0, 128], sizes = [17, 32], strides = [1, 1]} : vector<17x384xf32> to vector<17x32xf32>
    %50 = vector.extract_strided_slice %37 {offsets = [0, 160], sizes = [17, 32], strides = [1, 1]} : vector<17x384xf32> to vector<17x32xf32>
    %51 = vector.extract_strided_slice %37 {offsets = [0, 192], sizes = [17, 32], strides = [1, 1]} : vector<17x384xf32> to vector<17x32xf32>
    %52 = vector.extract_strided_slice %37 {offsets = [0, 224], sizes = [17, 32], strides = [1, 1]} : vector<17x384xf32> to vector<17x32xf32>
    %53 = vector.shape_cast %49 : vector<17x32xf32> to vector<1x17x32xf32>
    %54 = vector.shape_cast %50 : vector<17x32xf32> to vector<1x17x32xf32>
    %55 = vector.shape_cast %51 : vector<17x32xf32> to vector<1x17x32xf32>
    %56 = vector.shape_cast %52 : vector<17x32xf32> to vector<1x17x32xf32>
    %57 = tpu.concatenate %53, %54, %55, %56 in 0 : vector<1x17x32xf32>, vector<1x17x32xf32>, vector<1x17x32xf32>, vector<1x17x32xf32> -> vector<4x17x32xf32>
    %58 = vector.extract_strided_slice %37 {offsets = [0, 256], sizes = [17, 32], strides = [1, 1]} : vector<17x384xf32> to vector<17x32xf32>
    %59 = vector.extract_strided_slice %37 {offsets = [0, 288], sizes = [17, 32], strides = [1, 1]} : vector<17x384xf32> to vector<17x32xf32>
    %60 = vector.extract_strided_slice %37 {offsets = [0, 320], sizes = [17, 32], strides = [1, 1]} : vector<17x384xf32> to vector<17x32xf32>
    %61 = vector.extract_strided_slice %37 {offsets = [0, 352], sizes = [17, 32], strides = [1, 1]} : vector<17x384xf32> to vector<17x32xf32>
    %62 = vector.shape_cast %58 : vector<17x32xf32> to vector<1x17x32xf32>
    %63 = vector.shape_cast %59 : vector<17x32xf32> to vector<1x17x32xf32>
    %64 = vector.shape_cast %60 : vector<17x32xf32> to vector<1x17x32xf32>
    %65 = vector.shape_cast %61 : vector<17x32xf32> to vector<1x17x32xf32>
    %66 = tpu.concatenate %62, %63, %64, %65 in 0 : vector<1x17x32xf32>, vector<1x17x32xf32>, vector<1x17x32xf32>, vector<1x17x32xf32> -> vector<4x17x32xf32>
    %67 = tpu.iota {dimensions = array<i32: 0>} : vector<17x17xi32>
    %68 = tpu.iota {dimensions = array<i32: 1>} : vector<17x17xi32>
    %69 = arith.cmpi sle, %68, %67 : vector<17x17xi32>
    %cst_20 = arith.constant 0.000000e+00 : f32
    %cst_21 = arith.constant -1.000000e+30 : f32
    %70 = vector.broadcast %cst_20 : f32 to vector<17x17xf32>
    %71 = vector.broadcast %cst_21 : f32 to vector<17x17xf32>
    %72 = arith.select %69, %70, %71 : vector<17x17xi1>, vector<17x17xf32>
    %73 = arith.truncf %48 : vector<4x17x32xf32> to vector<4x17x32xbf16>
    %74 = arith.truncf %57 : vector<4x17x32xf32> to vector<4x17x32xbf16>
    %cst_22 = arith.constant dense<0.000000e+00> : vector<4x17x17xf32>
    %75 = tpu.matmul %73, %74, %cst_22 {dimension_numbers = #tpu.dot_dimension_numbers<[2], [2], [1], [1], [0, 0, 0, 1, 1, 1], [0], [0]>} : vector<4x17x32xbf16>, vector<4x17x32xbf16>, vector<4x17x17xf32> -> vector<4x17x17xf32>
    %76 = vector.shape_cast %72 : vector<17x17xf32> to vector<1x17x17xf32>
    %77 = vector.broadcast %76 : vector<1x17x17xf32> to vector<4x17x17xf32>
    %78 = arith.addf %75, %77 : vector<4x17x17xf32>
    %cst_23 = arith.constant dense<0xFF800000> : vector<4x17xf32>
    %79 = vector.multi_reduction <maximumf>, %78, %cst_23 [2] : vector<4x17x17xf32> to vector<4x17xf32>
    %80 = vector.shape_cast %79 : vector<4x17xf32> to vector<4x17x1xf32>
    %81 = vector.broadcast %80 : vector<4x17x1xf32> to vector<4x17x17xf32>
    %82 = arith.subf %78, %81 : vector<4x17x17xf32>
    %83 = math.exp %82 : vector<4x17x17xf32>
    %cst_24 = arith.constant dense<0.000000e+00> : vector<4x17xf32>
    %84 = vector.multi_reduction <add>, %83, %cst_24 [2] : vector<4x17x17xf32> to vector<4x17xf32>
    %85 = vector.shape_cast %84 : vector<4x17xf32> to vector<4x17x1xf32>
    %86 = tpu.reciprocal %85 {approx = true} : vector<4x17x1xf32> -> vector<4x17x1xf32>
    %87 = vector.broadcast %86 : vector<4x17x1xf32> to vector<4x17x17xf32>
    %88 = arith.mulf %83, %87 : vector<4x17x17xf32>
    %89 = arith.truncf %88 : vector<4x17x17xf32> to vector<4x17x17xbf16>
    %90 = arith.truncf %66 : vector<4x17x32xf32> to vector<4x17x32xbf16>
    %cst_25 = arith.constant dense<0.000000e+00> : vector<4x17x32xf32>
    %91 = tpu.matmul %89, %90, %cst_25 {dimension_numbers = #tpu.dot_dimension_numbers<[2], [1], [1], [2], [0, 0, 0, 1, 1, 2], [0], [0]>} : vector<4x17x17xbf16>, vector<4x17x32xbf16>, vector<4x17x32xf32> -> vector<4x17x32xf32>
    %92 = vector.extract_strided_slice %91 {offsets = [0, 0, 0], sizes = [1, 17, 32], strides = [1, 1, 1]} : vector<4x17x32xf32> to vector<1x17x32xf32>
    %93 = vector.shape_cast %92 : vector<1x17x32xf32> to vector<17x32xf32>
    %94 = vector.extract_strided_slice %91 {offsets = [1, 0, 0], sizes = [1, 17, 32], strides = [1, 1, 1]} : vector<4x17x32xf32> to vector<1x17x32xf32>
    %95 = vector.shape_cast %94 : vector<1x17x32xf32> to vector<17x32xf32>
    %96 = vector.extract_strided_slice %91 {offsets = [2, 0, 0], sizes = [1, 17, 32], strides = [1, 1, 1]} : vector<4x17x32xf32> to vector<1x17x32xf32>
    %97 = vector.shape_cast %96 : vector<1x17x32xf32> to vector<17x32xf32>
    %98 = vector.extract_strided_slice %91 {offsets = [3, 0, 0], sizes = [1, 17, 32], strides = [1, 1, 1]} : vector<4x17x32xf32> to vector<1x17x32xf32>
    %99 = vector.shape_cast %98 : vector<1x17x32xf32> to vector<17x32xf32>
    %100 = tpu.concatenate %93, %95, %97, %99 in 1 : vector<17x32xf32>, vector<17x32xf32>, vector<17x32xf32>, vector<17x32xf32> -> vector<17x128xf32>
    %101 = arith.truncf %100 : vector<17x128xf32> to vector<17x128xbf16>
    %c0_26 = arith.constant 0 : index
    %c0_27 = arith.constant 0 : index
    %c0_28 = arith.constant 0 : index
    %102 = vector.load %arg7[%c0_26, %c0_27, %c0_28] : memref<1x128x128xbf16, #tpu.memory_space<vmem>>, vector<1x128x128xbf16>
    %103 = vector.shape_cast %102 : vector<1x128x128xbf16> to vector<128x128xbf16>
    %cst_29 = arith.constant dense<0.000000e+00> : vector<17x128xf32>
    %104 = tpu.matmul %101, %103, %cst_29 {dimension_numbers = #tpu.dot_dimension_numbers<[1], [0], [0], [1], [0, 0, 1, 1], [], []>} : vector<17x128xbf16>, vector<128x128xbf16>, vector<17x128xf32> -> vector<17x128xf32>
    %c0_30 = arith.constant 0 : index
    %c0_31 = arith.constant 0 : index
    %c0_32 = arith.constant 0 : index
    %105 = vector.load %arg8[%c0_30, %c0_31, %c0_32] : memref<1x1x128xf32, #tpu.memory_space<vmem>>, vector<1x1x128xf32>
    %106 = vector.shape_cast %105 : vector<1x1x128xf32> to vector<1x128xf32>
    %107 = vector.broadcast %106 : vector<1x128xf32> to vector<17x128xf32>
    %108 = arith.addf %104, %107 : vector<17x128xf32>
    %109 = arith.addf %3, %108 : vector<17x128xf32>
    %c0_33 = arith.constant 0 : index
    %c0_34 = arith.constant 0 : index
    %c0_35 = arith.constant 0 : index
    %110 = vector.load %arg9[%c0_33, %c0_34, %c0_35] : memref<1x1x128xf32, #tpu.memory_space<vmem>>, vector<1x1x128xf32>
    %111 = vector.shape_cast %110 : vector<1x1x128xf32> to vector<1x128xf32>
    %c0_36 = arith.constant 0 : index
    %c0_37 = arith.constant 0 : index
    %c0_38 = arith.constant 0 : index
    %112 = vector.load %arg10[%c0_36, %c0_37, %c0_38] : memref<1x1x128xf32, #tpu.memory_space<vmem>>, vector<1x1x128xf32>
    %113 = vector.shape_cast %112 : vector<1x1x128xf32> to vector<1x128xf32>
    %cst_39 = arith.constant dense<0.000000e+00> : vector<17xf32>
    %114 = vector.multi_reduction <add>, %109, %cst_39 [1] : vector<17x128xf32> to vector<17xf32>
    %115 = vector.shape_cast %114 : vector<17xf32> to vector<17x1xf32>
    %cst_40 = arith.constant 1.280000e+02 : f32
    %116 = vector.broadcast %cst_40 : f32 to vector<17x1xf32>
    %117 = arith.divf %115, %116 : vector<17x1xf32>
    %118 = vector.broadcast %117 : vector<17x1xf32> to vector<17x128xf32>
    %119 = arith.subf %109, %118 : vector<17x128xf32>
    %120 = arith.mulf %119, %119 : vector<17x128xf32>
    %cst_41 = arith.constant dense<0.000000e+00> : vector<17xf32>
    %121 = vector.multi_reduction <add>, %120, %cst_41 [1] : vector<17x128xf32> to vector<17xf32>
    %122 = vector.shape_cast %121 : vector<17xf32> to vector<17x1xf32>
    %cst_42 = arith.constant 1.280000e+02 : f32
    %123 = vector.broadcast %cst_42 : f32 to vector<17x1xf32>
    %124 = arith.divf %122, %123 : vector<17x1xf32>
    %125 = vector.broadcast %117 : vector<17x1xf32> to vector<17x128xf32>
    %126 = arith.subf %109, %125 : vector<17x128xf32>
    %cst_43 = arith.constant 9.99999974E-6 : f32
    %127 = vector.broadcast %cst_43 : f32 to vector<17x1xf32>
    %128 = arith.addf %124, %127 : vector<17x1xf32>
    %129 = math.rsqrt %128 : vector<17x1xf32>
    %130 = vector.broadcast %129 : vector<17x1xf32> to vector<17x128xf32>
    %131 = arith.mulf %126, %130 : vector<17x128xf32>
    %132 = vector.broadcast %111 : vector<1x128xf32> to vector<17x128xf32>
    %133 = arith.mulf %131, %132 : vector<17x128xf32>
    %134 = vector.broadcast %113 : vector<1x128xf32> to vector<17x128xf32>
    %135 = arith.addf %133, %134 : vector<17x128xf32>
    %136 = arith.truncf %135 : vector<17x128xf32> to vector<17x128xbf16>
    %c0_44 = arith.constant 0 : index
    %c0_45 = arith.constant 0 : index
    %c0_46 = arith.constant 0 : index
    %137 = vector.load %arg11[%c0_44, %c0_45, %c0_46] : memref<1x128x512xbf16, #tpu.memory_space<vmem>>, vector<1x128x512xbf16>
    %138 = vector.shape_cast %137 : vector<1x128x512xbf16> to vector<128x512xbf16>
    %cst_47 = arith.constant dense<0.000000e+00> : vector<17x512xf32>
    %139 = tpu.matmul %136, %138, %cst_47 {dimension_numbers = #tpu.dot_dimension_numbers<[1], [0], [0], [1], [0, 0, 1, 1], [], []>} : vector<17x128xbf16>, vector<128x512xbf16>, vector<17x512xf32> -> vector<17x512xf32>
    %c0_48 = arith.constant 0 : index
    %c0_49 = arith.constant 0 : index
    %c0_50 = arith.constant 0 : index
    %140 = vector.load %arg12[%c0_48, %c0_49, %c0_50] : memref<1x1x512xf32, #tpu.memory_space<vmem>>, vector<1x1x512xf32>
    %141 = vector.shape_cast %140 : vector<1x1x512xf32> to vector<1x512xf32>
    %142 = vector.broadcast %141 : vector<1x512xf32> to vector<17x512xf32>
    %143 = arith.addf %139, %142 : vector<17x512xf32>
    %144 = arith.mulf %143, %143 : vector<17x512xf32>
    %145 = arith.mulf %143, %144 : vector<17x512xf32>
    %cst_51 = arith.constant 4.471500e-02 : f32
    %146 = vector.broadcast %cst_51 : f32 to vector<17x512xf32>
    %147 = arith.mulf %146, %145 : vector<17x512xf32>
    %148 = arith.addf %143, %147 : vector<17x512xf32>
    %cst_52 = arith.constant 0.797884583 : f32
    %149 = vector.broadcast %cst_52 : f32 to vector<17x512xf32>
    %150 = arith.mulf %149, %148 : vector<17x512xf32>
    %151 = math.tanh %150 : vector<17x512xf32>
    %cst_53 = arith.constant 1.000000e+00 : f32
    %152 = vector.broadcast %cst_53 : f32 to vector<17x512xf32>
    %153 = arith.addf %152, %151 : vector<17x512xf32>
    %cst_54 = arith.constant 5.000000e-01 : f32
    %154 = vector.broadcast %cst_54 : f32 to vector<17x512xf32>
    %155 = arith.mulf %154, %153 : vector<17x512xf32>
    %156 = arith.mulf %143, %155 : vector<17x512xf32>
    %157 = arith.truncf %156 : vector<17x512xf32> to vector<17x512xbf16>
    %c0_55 = arith.constant 0 : index
    %c0_56 = arith.constant 0 : index
    %c0_57 = arith.constant 0 : index
    %158 = vector.load %arg13[%c0_55, %c0_56, %c0_57] : memref<1x512x128xbf16, #tpu.memory_space<vmem>>, vector<1x512x128xbf16>
    %159 = vector.shape_cast %158 : vector<1x512x128xbf16> to vector<512x128xbf16>
    %cst_58 = arith.constant dense<0.000000e+00> : vector<17x128xf32>
    %160 = tpu.matmul %157, %159, %cst_58 {dimension_numbers = #tpu.dot_dimension_numbers<[1], [0], [0], [1], [0, 0, 1, 1], [], []>} : vector<17x512xbf16>, vector<512x128xbf16>, vector<17x128xf32> -> vector<17x128xf32>
    %c0_59 = arith.constant 0 : index
    %c0_60 = arith.constant 0 : index
    %c0_61 = arith.constant 0 : index
    %161 = vector.load %arg14[%c0_59, %c0_60, %c0_61] : memref<1x1x128xf32, #tpu.memory_space<vmem>>, vector<1x1x128xf32>
    %162 = vector.shape_cast %161 : vector<1x1x128xf32> to vector<1x128xf32>
    %163 = vector.broadcast %162 : vector<1x128xf32> to vector<17x128xf32>
    %164 = arith.addf %160, %163 : vector<17x128xf32>
    %165 = arith.addf %109, %164 : vector<17x128xf32>
    %c0_62 = arith.constant 0 : index
    %c0_63 = arith.constant 0 : index
    %166 = vector.load %arg16[%c0_62, %c0_63] : memref<17x128xf32, #tpu.memory_space<vmem>>, vector<17x128xf32>
    tpu.vector_store %arg16[%c0_62, %c0_63], %165 {strides = array<i32>} : memref<17x128xf32, #tpu.memory_space<vmem>>, vector<17x128xf32>,
    %c1_i32 = arith.constant 1 : i32
    %167 = arith.cmpi eq, %arg1, %c1_i32 : i32
    %168 = arith.extui %167 : i1 to i32
    %c0_i32_64 = arith.constant 0 : i32
    %169 = arith.cmpi ne, %168, %c0_i32_64 : i32
    scf.if %169 {
      %c0_65 = arith.constant 0 : index
      %c0_66 = arith.constant 0 : index
      %c0_67 = arith.constant 0 : index
      %170 = vector.load %arg15[%c0_65, %c0_66, %c0_67] : memref<1x17x128xf32, #tpu.memory_space<vmem>>, vector<1x17x128xf32>
      %171 = vector.shape_cast %170 : vector<1x17x128xf32> to vector<17x128xf32>
      %172 = vector.shape_cast %165 : vector<17x128xf32> to vector<1x17x128xf32>
      tpu.vector_store %arg15[%c0_65, %c0_66, %c0_67], %172 {strides = array<i32>} : memref<1x17x128xf32, #tpu.memory_space<vmem>>, vector<1x17x128xf32>,
    } else {
    }
    return
  }
  func.func @transform_0(%arg0: i32, %arg1: i32) -> (i32, i32, i32) {
    %c0_i32 = arith.constant 0 : i32
    %c0_i32_0 = arith.constant 0 : i32
    %c0_i32_1 = arith.constant 0 : i32
    return %arg0, %c0_i32, %c0_i32_0 : i32, i32, i32
  }
  func.func @transform_1(%arg0: i32, %arg1: i32) -> (i32, i32, i32) {
    %c0_i32 = arith.constant 0 : i32
    %c0_i32_0 = arith.constant 0 : i32
    %c0_i32_1 = arith.constant 0 : i32
    return %arg1, %c0_i32, %c0_i32_0 : i32, i32, i32
  }
  func.func @transform_2(%arg0: i32, %arg1: i32) -> (i32, i32, i32) {
    %c0_i32 = arith.constant 0 : i32
    %c0_i32_0 = arith.constant 0 : i32
    %c0_i32_1 = arith.constant 0 : i32
    return %arg1, %c0_i32, %c0_i32_0 : i32, i32, i32
  }
  func.func @transform_3(%arg0: i32, %arg1: i32) -> (i32, i32, i32) {
    %c0_i32 = arith.constant 0 : i32
    %c0_i32_0 = arith.constant 0 : i32
    %c0_i32_1 = arith.constant 0 : i32
    return %arg1, %c0_i32, %c0_i32_0 : i32, i32, i32
  }
  func.func @transform_4(%arg0: i32, %arg1: i32) -> (i32, i32, i32) {
    %c0_i32 = arith.constant 0 : i32
    %c0_i32_0 = arith.constant 0 : i32
    %c0_i32_1 = arith.constant 0 : i32
    return %arg1, %c0_i32, %c0_i32_0 : i32, i32, i32
  }
  func.func @transform_5(%arg0: i32, %arg1: i32) -> (i32, i32, i32) {
    %c0_i32 = arith.constant 0 : i32
    %c0_i32_0 = arith.constant 0 : i32
    %c0_i32_1 = arith.constant 0 : i32
    return %arg1, %c0_i32, %c0_i32_0 : i32, i32, i32
  }
  func.func @transform_6(%arg0: i32, %arg1: i32) -> (i32, i32, i32) {
    %c0_i32 = arith.constant 0 : i32
    %c0_i32_0 = arith.constant 0 : i32
    %c0_i32_1 = arith.constant 0 : i32
    return %arg1, %c0_i32, %c0_i32_0 : i32, i32, i32
  }
  func.func @transform_7(%arg0: i32, %arg1: i32) -> (i32, i32, i32) {
    %c0_i32 = arith.constant 0 : i32
    %c0_i32_0 = arith.constant 0 : i32
    %c0_i32_1 = arith.constant 0 : i32
    return %arg1, %c0_i32, %c0_i32_0 : i32, i32, i32
  }
  func.func @transform_8(%arg0: i32, %arg1: i32) -> (i32, i32, i32) {
    %c0_i32 = arith.constant 0 : i32
    %c0_i32_0 = arith.constant 0 : i32
    %c0_i32_1 = arith.constant 0 : i32
    return %arg1, %c0_i32, %c0_i32_0 : i32, i32, i32
  }
  func.func @transform_9(%arg0: i32, %arg1: i32) -> (i32, i32, i32) {
    %c0_i32 = arith.constant 0 : i32
    %c0_i32_0 = arith.constant 0 : i32
    %c0_i32_1 = arith.constant 0 : i32
    return %arg1, %c0_i32, %c0_i32_0 : i32, i32, i32
  }
  func.func @transform_10(%arg0: i32, %arg1: i32) -> (i32, i32, i32) {
    %c0_i32 = arith.constant 0 : i32
    %c0_i32_0 = arith.constant 0 : i32
    %c0_i32_1 = arith.constant 0 : i32
    return %arg1, %c0_i32, %c0_i32_0 : i32, i32, i32
  }
  func.func @transform_11(%arg0: i32, %arg1: i32) -> (i32, i32, i32) {
    %c0_i32 = arith.constant 0 : i32
    %c0_i32_0 = arith.constant 0 : i32
    %c0_i32_1 = arith.constant 0 : i32
    return %arg1, %c0_i32, %c0_i32_0 : i32, i32, i32
  }
  func.func @transform_12(%arg0: i32, %arg1: i32) -> (i32, i32, i32) {
    %c0_i32 = arith.constant 0 : i32
    %c0_i32_0 = arith.constant 0 : i32
    %c0_i32_1 = arith.constant 0 : i32
    return %arg1, %c0_i32, %c0_i32_0 : i32, i32, i32
  }
  func.func @transform_13(%arg0: i32, %arg1: i32) -> (i32, i32, i32) {
    %c0_i32 = arith.constant 0 : i32
    %c0_i32_0 = arith.constant 0 : i32
    %c0_i32_1 = arith.constant 0 : i32
    return %arg0, %c0_i32, %c0_i32_0 : i32, i32, i32
  }
}

module attributes {stable_mosaic.version = 11 : i64} {
  func.func @_head_loss_kernel(%arg0: i32, %arg1: memref<32x128xf32, #tpu.memory_space<vmem>>, %arg2: memref<1x128xf32, #tpu.memory_space<vmem>>, %arg3: memref<1x128xf32, #tpu.memory_space<vmem>>, %arg4: memref<128x128xbf16, #tpu.memory_space<vmem>>, %arg5: memref<1x128xf32, #tpu.memory_space<vmem>>, %arg6: memref<32x128xf32, #tpu.memory_space<vmem>>, %arg7: memref<32x128xf32, #tpu.memory_space<vmem>>, %arg8: memref<1x1xf32, #tpu.memory_space<smem>>) attributes {dimension_semantics = [#tpu.dimension_semantics<parallel>], iteration_bounds = array<i64: 1>, scalar_prefetch = 0 : i64, scratch_operands = 0 : i64, tpu.core_type = #tpu.core_type<tc>, window_params = [{transform_indices = @transform_0, window_bounds = array<i64: 32, 128>}, {pipeline_mode = #tpu.pipeline_mode<synchronous>, transform_indices = @transform_1, window_bounds = array<i64: 1, 128>}, {pipeline_mode = #tpu.pipeline_mode<synchronous>, transform_indices = @transform_2, window_bounds = array<i64: 1, 128>}, {pipeline_mode = #tpu.pipeline_mode<synchronous>, transform_indices = @transform_3, window_bounds = array<i64: 128, 128>}, {pipeline_mode = #tpu.pipeline_mode<synchronous>, transform_indices = @transform_4, window_bounds = array<i64: 1, 128>}, {transform_indices = @transform_5, window_bounds = array<i64: 32, 128>}, {transform_indices = @transform_6, window_bounds = array<i64: 32, 128>}, {transform_indices = @transform_7, window_bounds = array<i64: 1, 1>}]} {
    %c0 = arith.constant 0 : index
    %c0_0 = arith.constant 0 : index
    %0 = vector.load %arg1[%c0, %c0_0] : memref<32x128xf32, #tpu.memory_space<vmem>>, vector<32x128xf32>
    %c0_1 = arith.constant 0 : index
    %c0_2 = arith.constant 0 : index
    %1 = vector.load %arg2[%c0_1, %c0_2] : memref<1x128xf32, #tpu.memory_space<vmem>>, vector<1x128xf32>
    %c0_3 = arith.constant 0 : index
    %c0_4 = arith.constant 0 : index
    %2 = vector.load %arg3[%c0_3, %c0_4] : memref<1x128xf32, #tpu.memory_space<vmem>>, vector<1x128xf32>
    %cst = arith.constant dense<0.000000e+00> : vector<32xf32>
    %3 = vector.multi_reduction <add>, %0, %cst [1] : vector<32x128xf32> to vector<32xf32>
    %4 = vector.shape_cast %3 : vector<32xf32> to vector<32x1xf32>
    %cst_5 = arith.constant 1.280000e+02 : f32
    %5 = vector.broadcast %cst_5 : f32 to vector<32x1xf32>
    %6 = arith.divf %4, %5 : vector<32x1xf32>
    %7 = vector.broadcast %6 : vector<32x1xf32> to vector<32x128xf32>
    %8 = arith.subf %0, %7 : vector<32x128xf32>
    %9 = arith.mulf %8, %8 : vector<32x128xf32>
    %cst_6 = arith.constant dense<0.000000e+00> : vector<32xf32>
    %10 = vector.multi_reduction <add>, %9, %cst_6 [1] : vector<32x128xf32> to vector<32xf32>
    %11 = vector.shape_cast %10 : vector<32xf32> to vector<32x1xf32>
    %cst_7 = arith.constant 1.280000e+02 : f32
    %12 = vector.broadcast %cst_7 : f32 to vector<32x1xf32>
    %13 = arith.divf %11, %12 : vector<32x1xf32>
    %14 = vector.broadcast %6 : vector<32x1xf32> to vector<32x128xf32>
    %15 = arith.subf %0, %14 : vector<32x128xf32>
    %cst_8 = arith.constant 9.99999974E-6 : f32
    %16 = vector.broadcast %cst_8 : f32 to vector<32x1xf32>
    %17 = arith.addf %13, %16 : vector<32x1xf32>
    %18 = math.rsqrt %17 : vector<32x1xf32>
    %19 = vector.broadcast %18 : vector<32x1xf32> to vector<32x128xf32>
    %20 = arith.mulf %15, %19 : vector<32x128xf32>
    %21 = vector.broadcast %1 : vector<1x128xf32> to vector<32x128xf32>
    %22 = arith.mulf %20, %21 : vector<32x128xf32>
    %23 = vector.broadcast %2 : vector<1x128xf32> to vector<32x128xf32>
    %24 = arith.addf %22, %23 : vector<32x128xf32>
    %25 = arith.truncf %24 : vector<32x128xf32> to vector<32x128xbf16>
    %c0_9 = arith.constant 0 : index
    %c0_10 = arith.constant 0 : index
    %26 = vector.load %arg4[%c0_9, %c0_10] : memref<128x128xbf16, #tpu.memory_space<vmem>>, vector<128x128xbf16>
    %cst_11 = arith.constant dense<0.000000e+00> : vector<32x128xf32>
    %27 = tpu.matmul %25, %26, %cst_11 {dimension_numbers = #tpu.dot_dimension_numbers<[1], [0], [0], [1], [0, 0, 1, 1], [], []>} : vector<32x128xbf16>, vector<128x128xbf16>, vector<32x128xf32> -> vector<32x128xf32>
    %c0_12 = arith.constant 0 : index
    %c0_13 = arith.constant 0 : index
    %28 = vector.load %arg5[%c0_12, %c0_13] : memref<1x128xf32, #tpu.memory_space<vmem>>, vector<1x128xf32>
    %29 = vector.broadcast %28 : vector<1x128xf32> to vector<32x128xf32>
    %30 = arith.addf %27, %29 : vector<32x128xf32>
    %c0_14 = arith.constant 0 : index
    %c0_15 = arith.constant 0 : index
    %31 = vector.load %arg7[%c0_14, %c0_15] : memref<32x128xf32, #tpu.memory_space<vmem>>, vector<32x128xf32>
    tpu.vector_store %arg7[%c0_14, %c0_15], %30 {strides = array<i32>} : memref<32x128xf32, #tpu.memory_space<vmem>>, vector<32x128xf32>,
    %c0_16 = arith.constant 0 : index
    %c0_17 = arith.constant 0 : index
    %32 = vector.load %arg6[%c0_16, %c0_17] : memref<32x128xf32, #tpu.memory_space<vmem>>, vector<32x128xf32>
    %33 = arith.subf %30, %32 : vector<32x128xf32>
    %34 = arith.mulf %33, %33 : vector<32x128xf32>
    %35 = vector.shape_cast %34 : vector<32x128xf32> to vector<1x32x128xf32>
    %cst_18 = arith.constant dense<0.000000e+00> : vector<1xf32>
    %36 = vector.multi_reduction <add>, %35, %cst_18 [1, 2] : vector<1x32x128xf32> to vector<1xf32>
    %37 = vector.shape_cast %36 : vector<1xf32> to vector<1x1x1xf32>
    %38 = vector.extract %37[0, 0, 0] : f32 from vector<1x1x1xf32>
    %c0_19 = arith.constant 0 : index
    %c0_20 = arith.constant 0 : index
    %39 = memref.load %arg8[%c0_19, %c0_20] : memref<1x1xf32, #tpu.memory_space<smem>>
    memref.store %38, %arg8[%c0_19, %c0_20] : memref<1x1xf32, #tpu.memory_space<smem>>
    return
  }
  func.func @transform_0(%arg0: i32) -> (i32, i32) {
    %c0_i32 = arith.constant 0 : i32
    %c0_i32_0 = arith.constant 0 : i32
    return %arg0, %c0_i32 : i32, i32
  }
  func.func @transform_1(%arg0: i32) -> (i32, i32) {
    %c0_i32 = arith.constant 0 : i32
    %c0_i32_0 = arith.constant 0 : i32
    %c0_i32_1 = arith.constant 0 : i32
    return %c0_i32, %c0_i32_0 : i32, i32
  }
  func.func @transform_2(%arg0: i32) -> (i32, i32) {
    %c0_i32 = arith.constant 0 : i32
    %c0_i32_0 = arith.constant 0 : i32
    %c0_i32_1 = arith.constant 0 : i32
    return %c0_i32, %c0_i32_0 : i32, i32
  }
  func.func @transform_3(%arg0: i32) -> (i32, i32) {
    %c0_i32 = arith.constant 0 : i32
    %c0_i32_0 = arith.constant 0 : i32
    %c0_i32_1 = arith.constant 0 : i32
    return %c0_i32, %c0_i32_0 : i32, i32
  }
  func.func @transform_4(%arg0: i32) -> (i32, i32) {
    %c0_i32 = arith.constant 0 : i32
    %c0_i32_0 = arith.constant 0 : i32
    %c0_i32_1 = arith.constant 0 : i32
    return %c0_i32, %c0_i32_0 : i32, i32
  }
  func.func @transform_5(%arg0: i32) -> (i32, i32) {
    %c0_i32 = arith.constant 0 : i32
    %c0_i32_0 = arith.constant 0 : i32
    return %arg0, %c0_i32 : i32, i32
  }
  func.func @transform_6(%arg0: i32) -> (i32, i32) {
    %c0_i32 = arith.constant 0 : i32
    %c0_i32_0 = arith.constant 0 : i32
    return %arg0, %c0_i32 : i32, i32
  }
  func.func @transform_7(%arg0: i32) -> (i32, i32) {
    %c0_i32 = arith.constant 0 : i32
    %c0_i32_0 = arith.constant 0 : i32
    return %arg0, %c0_i32 : i32, i32
  }
}

</mosaic_0001>

<bundles_post_ra>
// kernel: cgpt_ar_forward.3
= control target key start
LH: loop header
LB: loop body
LE: loop exit
PB: predicated region body
PF: predicated region fallthrough
CT: control target
= control target key end

     0   :  { %vm60_vm0 = vcmask 392192   ;;  %s202_s1 = inlined_call_operand.vmem [shape: bf16[48,128], index: 1, kind: input, shape index: {}]   ;;  %s203_s0 = inlined_call_operand.vmem [shape: bf16[32,48], index: 0, kind: input, shape index: {}]   ;;  %s204_s2 = inlined_call_operand.vmem [shape: f32[1,128], index: 2, kind: input, shape index: {}]   ;;  %s205_s3 = inlined_call_operand.vmem [shape: f32[32,128], index: 3, kind: output, shape index: {}]  }
   0x1   :  { %v147_v0 = vld [vmem:[%s202_s1 + $0x10] sm:$0xff]   ;;  %v148_v1 = vld [vmem:[%s202_s1 + $0x8] sm:$0xff]   ;;  %v150_v2 = vld [vmem:[%s203_s0] sm:$0xff]  }
   0x2   :  { %137 = vmatprep.subr.bf16.mxu0 %v147_v0  ;;  %v149_v3 = vld [vmem:[%s202_s1] sm:$0xff]   ;;  %143 = vmatprep.mubr.msk.bf16.mxu0 %vm60_vm0, %v150_v2  ;;  %v151_v4 = vld [vmem:[%s203_s0 + $0x8] sm:$0xff]  }
   0x3   :  { %138 = vmatpush3.bf16.msra.mxu0 %v147_v0  ;;  %v124_v5 = vld [vmem:[%s204_s2] ss:$0 sm:$0xff] }
   0x4   :  { %139 = vmatprep.subr.bf16.mxu0 %v148_v1 }
   0x7   :  { %140 = vmatpush3.bf16.msra.mxu0 %v148_v1 }
   0x8   :  { %141 = vmatprep.subr.bf16.mxu0 %v149_v3 }
   0xb   :  { %142 = vmatpush3.bf16.msra.mxu0 %v149_v3 }
   0xe   :  { %144 = vmatmul.mubr.msk.bf16.vlgmr.msra.gmra.mxu0 %vm60_vm0, %v151_v4 }
  0xce   :  { %v145_v6 = vpop.f32.mrf.mxu0 }
  0xcf   :  { %v110_v7 = vadd.f32 %v145_v6, %v124_v5 }
  0xd0   :  { %v101_v8 = vpop.f32.mrf.mxu0 }
  0xd1   :  { %118 = vst [vmem:[%s205_s3 + $0x10] sm:$0xff] %v110_v7  ;;  %v102_v9 = vadd.f32 %v124_v5, %v101_v8 }
  0xd2   :  { %v146_v10 = vpop.f32.mrf.mxu0 }
  0xd3   :  { %116 = vst [vmem:[%s205_s3] sm:$0xff] %v102_v9  ;;  %v113_v11 = vadd.f32 %v146_v10, %v124_v5 }
  0xd4   :  { %v104_v12 = vpop.f32.mrf.mxu0 }
  0xd5   :  { %119 = vst [vmem:[%s205_s3 + $0x18] sm:$0xff] %v113_v11  ;;  %v105_v13 = vadd.f32 %v124_v5, %v104_v12 }
  0xd7   :  { %117 = vst [vmem:[%s205_s3 + $0x8] sm:$0xff] %v105_v13 }

// kernel: cgpt_ar_forward.5
= control target key start
LH: loop header
LB: loop body
LE: loop exit
PB: predicated region body
PF: predicated region fallthrough
CT: control target
= control target key end

     0   :  { %13 = vsyncpa [#allocation3], 0  ;;  %s487_s0 = inlined_call_operand.vmem [shape: f32[32,128], index: 0, kind: input, shape index: {}]   ;;  %s488_s1 = inlined_call_operand.vmem [shape: f32[1,128], index: 1, kind: input, shape index: {}]   ;;  %s489_s2 = inlined_call_operand.vmem [shape: f32[1,128], index: 2, kind: input, shape index: {}]   ;;  %s490_s3 = inlined_call_operand.vmem [shape: bf16[128,128], index: 3, kind: input, shape index: {}]   ;;  %s491_s4 = inlined_call_operand.vmem [shape: f32[1,128], index: 4, kind: input, shape index: {}]   ;;  %s492_s5 = inlined_call_operand.vmem [shape: f32[32,128], index: 5, kind: input, shape index: {}]   ;;  %s493_s6 = inlined_call_operand.hbm [shape: f32[32,128], index: 6, kind: output, shape index: {0}]   ;;  %s494_s7 = inlined_call_operand.hbm [shape: f32[1,1], index: 7, kind: output, shape index: {1}]  }
   0x1   :  { %v28_v0 = vld [vmem:[%s487_s0] sm:$0xff]  ;;  %v30_v1 = vld [vmem:[%s487_s0 + $0x10] sm:$0xff]  ;;  %v29_v2 = vld [vmem:[%s487_s0 + $0x8] sm:$0xff] }
   0x2   :  { %34 = vadd.xlane.f32.xlu0 %v28_v0  ;;  %38 = vadd.xlane.f32.xlu1 %v30_v1  ;;  %v31_v3 = vld [vmem:[%s487_s0 + $0x18] sm:$0xff] }
   0x6   :  { %36 = vadd.xlane.f32.xlu0 %v29_v2  ;;  %40 = vadd.xlane.f32.xlu1 %v31_v3 }
   0x7   :  { %14 = vsyncpa [#allocation4], 0  ;;  %v327_v20 = vld [vmem:[%s490_s3 + $0x38] sm:$0xff]   ;;  %v328_v21 = vld [vmem:[%s490_s3 + $0x30] sm:$0xff]   ;;  %s375_s10 = smov [#allocation2]  }
   0x8   :  { %301 = vmatprep.subr.bf16.mxu0 %v327_v20  ;;  %v329_v22 = vld [vmem:[%s490_s3 + $0x28] sm:$0xff]   ;;  %v330_v23 = vld [vmem:[%s490_s3 + $0x20] sm:$0xff]   ;;  %v331_v24 = vld [vmem:[%s490_s3 + $0x18] sm:$0xff]   ;;  %s256_s11 = sshll.u32 %s375_s10, 4  ;;  %s257_s11 = int_to_ptr.vmem [resolvable:$true] %s256_s11 }
   0x9   :  { %302 = vmatpush3.bf16.msra.mxu0 %v327_v20  ;;  %v332_v25 = vld [vmem:[%s490_s3 + $0x10] sm:$0xff]   ;;  %v333_v26 = vld [vmem:[%s490_s3 + $0x8] sm:$0xff]   ;;  %v334_v27 = vld [vmem:[%s490_s3] sm:$0xff]   ;;  %s343_s12 = scalar_lea.vmem %s257_s11, 512  ;;  %p348_p1 = scmp.lt.s32.totalorder %s257_s11, %s257_s11 }
   0xa   :  { %303 = vmatprep.subr.bf16.mxu0 %v328_v21  ;;  %v280_v42 = vld [vmem:[%s488_s1] ss:$0 sm:$0xff]  ;;  %p344_p0 = scmp.ne.s32.totalorder %s257_s11, %s343_s12  ;;  %p349_p2 = scmp.lt.s32.totalorder %s343_s12, %s343_s12 }
   0xb   :  { %v281_v47 = vld [vmem:[%s489_s2] ss:$0 sm:$0xff] }
   0xc   :  { %v282_v60 = vld [vmem:[%s491_s4] ss:$0 sm:$0xff]  ;;  %p350_p3 = por %p349_p2, %p348_p1 }
   0xd   :  { %304 = vmatpush3.bf16.msra.mxu0 %v328_v21 }
   0xe   :  { %305 = vmatprep.subr.bf16.mxu0 %v329_v22  ;;  %p351_p4 = pnand %p350_p3, %p344_p0 }
  0x11   :  { %306 = vmatpush3.bf16.msra.mxu0 %v329_v22 }
  0x12   :  { %307 = vmatprep.subr.bf16.mxu0 %v330_v23 }
  0x15   :  { %308 = vmatpush3.bf16.msra.mxu0 %v330_v23 }
  0x16   :  { %309 = vmatprep.subr.bf16.mxu0 %v331_v24 }
  0x19   :  { %310 = vmatpush3.bf16.msra.mxu0 %v331_v24 }
  0x1a   :  { %311 = vmatprep.subr.bf16.mxu0 %v332_v25 }
  0x1d   :  { %312 = vmatpush3.bf16.msra.mxu0 %v332_v25 }
  0x1e   :  { %313 = vmatprep.subr.bf16.mxu0 %v333_v26 }
  0x21   :  { %314 = vmatpush3.bf16.msra.mxu0 %v333_v26 }
  0x22   :  { %315 = vmatprep.subr.bf16.mxu0 %v334_v27 }
  0x25   :  { %316 = vmatpush3.bf16.msra.mxu0 %v334_v27 }
  0x8b   :  { %v35_v4 = vpop.xlane.xlu0 %34  ;;  %v39_v5 = vpop.xlane.xlu1 %38 }
  0x8c   :  { %v43_v6 = vmul.f32 0.0078125, %v35_v4  ;;  %v45_v7 = vmul.f32 0.0078125, %v39_v5  ;;  %v227_v4 = vld [vmem:[%s492_s5 + $0x10] sm:$0xff] }
  0x8e   :  { %v47_v8 = vsub.f32 %v28_v0, %v43_v6  ;;  %v431_v9 = vsub.f32 %v30_v1, %v45_v7  ;;  %v225_v1 = vld [vmem:[%s492_s5] sm:$0xff]  ;;  %v226_v6 = vld [vmem:[%s492_s5 + $0x8] sm:$0xff] }
  0x8f   :  { %v37_v10 = vpop.xlane.xlu0 %36  ;;  %v41_v11 = vpop.xlane.xlu1 %40 }
  0x90   :  { %v44_v12 = vmul.f32 0.0078125, %v37_v10  ;;  %v51_v13 = vmul.f32 %v47_v8, %v47_v8  ;;  %v46_v14 = vmul.f32 0.0078125, %v41_v11  ;;  %v53_v17 = vmul.f32 %v431_v9, %v431_v9 }
  0x92   :  { %v48_v15 = vsub.f32 %v29_v2, %v44_v12  ;;  %55 = vadd.xlane.f32.xlu0 %v51_v13  ;;  %v50_v16 = vsub.f32 %v31_v3, %v46_v14 }
  0x94   :  { %v52_v18 = vmul.f32 %v48_v15, %v48_v15  ;;  %v54_v19 = vmul.f32 %v50_v16, %v50_v16 }
  0x96   :  { %59 = vadd.xlane.f32.xlu0 %v53_v17  ;;  %57 = vadd.xlane.f32.xlu1 %v52_v18 }
  0x9a   :  { %61 = vadd.xlane.f32.xlu1 %v54_v19 }
 0x11b   :  { %v56_v28 = vpop.xlane.xlu0 %55 }
 0x11c   :  { %v63_v29 = vmul.f32 0.0078125, %v56_v28 }
 0x11e   :  { %v67_v30 = vadd.f32 1e-05, %v63_v29 }
 0x11f   :  { %v58_v31 = vpop.xlane.xlu1 %57  ;;  %v60_v32 = vpop.xlane.xlu0 %59 }
 0x120   :  { %335 = vrsqrt.f32 %v67_v30  ;;  %v64_v33 = vmul.f32 0.0078125, %v58_v31  ;;  %v65_v34 = vmul.f32 0.0078125, %v60_v32 }
 0x122   :  { %v68_v35 = vadd.f32 1e-05, %v64_v33  ;;  %v69_v36 = vadd.f32 1e-05, %v65_v34 }
 0x123   :  { %v62_v37 = vpop.xlane.xlu1 %61 }
 0x124   :  { %337 = vrsqrt.f32 %v68_v35  ;;  %v66_v38 = vmul.f32 0.0078125, %v62_v37 }
 0x125   :  { %339 = vrsqrt.f32 %v69_v36 }
 0x126   :  { %v70_v39 = vadd.f32 1e-05, %v66_v38 }
 0x128   :  { %341 = vrsqrt.f32 %v70_v39 }
 0x12d   :  { %v336_v40 = vpop.eup %335 }
 0x12e   :  { %v75_v41 = vmul.f32 %v336_v40, %v47_v8 }
 0x130   :  { %v85_v46 = vmul.f32 %v280_v42, %v75_v41 }
 0x131   :  { %v338_v43 = vpop.eup %337 }
 0x132   :  { %v340_v44 = vpop.eup %339  ;;  %v76_v45 = vmul.f32 %v338_v43, %v48_v15  ;;  %v95_v51 = vadd.f32 %v281_v47, %v85_v46 }
 0x133   :  { %v77_v48 = vmul.f32 %v340_v44, %v431_v9  ;;  %v228_v9 = vld [vmem:[%s492_s5 + $0x18] sm:$0xff] }
 0x134   :  { %v86_v49 = vmul.f32 %v280_v42, %v76_v45 }
 0x135   :  { %v342_v50 = vpop.eup %341  ;;  %v87_v54 = vmul.f32 %v280_v42, %v77_v48 }
 0x136   :  { %v96_v52 = vadd.f32 %v281_v47, %v86_v49  ;;  %v78_v53 = vmul.f32 %v342_v50, %v50_v16 }
 0x137   :  { %v97_v57 = vadd.f32 %v281_v47, %v87_v54 }
 0x138   :  { %v99_v55 = vpack.c.bf16 %v96_v52, %v95_v51  ;;  %v88_v56 = vmul.f32 %v280_v42, %v78_v53 }
 0x13a   :  { %317 = vmatprep.mubr.bf16.mxu0 %v99_v55  ;;  %v98_v58 = vadd.f32 %v281_v47, %v88_v56 }
 0x13c   :  { %v100_v59 = vpack.c.bf16 %v98_v58, %v97_v57 }
 0x13e   :  { %318 = vmatmul.mubr.bf16.vlgmr.msra.gmra.mxu0 %v100_v59 }
 0x1fe   :  { %v319_v61 = vpop.f32.mrf.mxu0 }
 0x1ff   :  { %v215_v62 = vadd.f32 %v319_v61, %v282_v60 }
 0x200   :  { %v206_v63 = vpop.f32.mrf.mxu0 }
 0x201   :  { %223 = vst [vmem:[#allocation2 + $0x10] sm:$0xff] %v215_v62  ;;  %v207_v0 = vadd.f32 %v282_v60, %v206_v63  ;;  %v231_v10 = vsub.f32 %v215_v62, %v227_v4 }
 0x202   :  { %v320_v2 = vpop.f32.mrf.mxu0 }
 0x203   :  { %221 = vst [vmem:[#allocation2] sm:$0xff] %v207_v0  ;;  %v218_v3 = vadd.f32 %v320_v2, %v282_v60  ;;  %v229_v7 = vsub.f32 %v207_v0, %v225_v1  ;;  %v235_v15 = vmul.f32 %v231_v10, %v231_v10 }
 0x204   :  { %v209_v5 = vpop.f32.mrf.mxu0 }
 0x205   :  { %224 = vst [vmem:[#allocation2 + $0x18] sm:$0xff] %v218_v3  ;;  %v210_v8 = vadd.f32 %v282_v60, %v209_v5  ;;  %v233_v12 = vmul.f32 %v229_v7, %v229_v7  ;;  %v232_v13 = vsub.f32 %v218_v3, %v228_v9 }
 0x207   :  { %222 = vst [vmem:[#allocation2 + $0x8] sm:$0xff] %v210_v8  ;;  %v230_v11 = vsub.f32 %v210_v8, %v226_v6  ;;  %v236_v17 = vmul.f32 %v232_v13, %v232_v13 }
 0x209   :  { %v234_v14 = vmul.f32 %v230_v11, %v230_v11 }
 0x20b   :  { %v237_v16 = vadd.f32 %v234_v14, %v233_v12 }
 0x20d   :  { %v238_v18 = vadd.f32 %v237_v16, %v235_v15 }
 0x20f   :  { %v239_v19 = vadd.f32 %v238_v18, %v236_v17 }
 0x211   :  { %240 = vadd.xlane.f32.xlu0 %v239_v19 }
 0x212   :  { %354 = shalt.err (!%p351_p4)
}
 0x213   :  { %s376_s5 = smov 128   ;;  %s377_s13 = smov 8  }
 0x214   :  { %262 = dma.vmem_to_hbm [thread:$0]  %s257_s11, 512, %s493_s6, [#allocation3], %s376_s5, %s376_s5, %s377_s13  }
 0x215   :  { %s378_s17 = smov [#allocation5]  }
 0x29a   :  { %v241_v20 = vpop.xlane.xlu0 %240 }
 0x29b   :  { %v242_v21 = vrot.slane %v241_v20, 4 }
 0x29d   :  { %v243_v22 = vadd.f32 %v242_v21, %v241_v20 }
 0x29f   :  { %v244_v23 = vrot.slane %v243_v22, 2 }
 0x2a1   :  { %v245_v24 = vadd.f32 %v244_v23, %v243_v22 }
 0x2a3   :  { %v246_v25 = vrot.slane %v245_v24, 1 }
 0x2a5   :  { %v247_v26 = vadd.f32 %v246_v25, %v245_v24 }
 0x2a7   :  { %321 = vpush %v247_v26 }
 0x2d8   :  { %s322_s16 = spop %321 }
 0x2d9   :  { %250 = sst [smem:[#allocation5]] %s322_s16 }
 0x2da   :  { %270 = dma.smem_to_hbm %s378_s17, 16, %s494_s7, [#allocation4]  }
 0x2db   :  { %371 = dma.done.wait [#allocation3], 512  }
 0x2dc   :  { %372 = vsyncadd [#allocation3], 4294966784 }
 0x2dd   :  { %373 = dma.done.wait [#allocation4], 16  }
 0x2de   :  { %374 = vsyncadd [#allocation4], 4294967280 }
 0x2df   :  { %277 = sfence }
 0x2e0   :  { %278 = vsyncpa [#allocation3], 1 }
 0x2e1   :  { %279 = vsyncpa [#allocation4], 1 }

// kernel: cgpt_ar_forward.4
= control target key start
LH: loop header
LB: loop body
LE: loop exit
PB: predicated region body
PF: predicated region fallthrough
CT: control target
= control target key end

     0   :  { %s3750_s25 = smov 0   ;;  %s3752_s26 = smov 0   ;;  %s4399_s0 = inlined_call_operand.vmem [shape: f32[2,17,128], index: 0, kind: input, shape index: {}, may-alias: {0,13}]   ;;  %s4400_s1 = inlined_call_operand.vmem [shape: f32[2,1,128], index: 1, kind: input, shape index: {}]   ;;  %s4401_s2 = inlined_call_operand.vmem [shape: f32[2,1,128], index: 2, kind: input, shape index: {}]   ;;  %s4402_s3 = inlined_call_operand.vmem [shape: bf16[2,128,384], index: 3, kind: input, shape index: {}]   ;;  %s4403_s4 = inlined_call_operand.vmem [shape: f32[2,1,384], index: 4, kind: input, shape index: {}]   ;;  %s4404_s5 = inlined_call_operand.vmem [shape: bf16[2,128,128], index: 5, kind: input, shape index: {}]   ;;  %s4405_s6 = inlined_call_operand.vmem [shape: f32[2,1,128], index: 6, kind: input, shape index: {}]   ;;  %s4406_s7 = inlined_call_operand.vmem [shape: f32[2,1,128], index: 7, kind: input, shape index: {}]   ;;  %s4407_s8 = inlined_call_operand.vmem [shape: f32[2,1,128], index: 8, kind: input, shape index: {}]   ;;  %s4408_s9 = inlined_call_operand.vmem [shape: bf16[2,128,512], index: 9, kind: input, shape index: {}]   ;;  %s4409_s10 = inlined_call_operand.vmem [shape: f32[2,1,512], index: 10, kind: input, shape index: {}]   ;;  %s4410_s11 = inlined_call_operand.vmem [shape: bf16[2,512,128], index: 11, kind: input, shape index: {}]   ;;  %s4411_s12 = inlined_call_operand.vmem [shape: f32[2,1,128], index: 12, kind: input, shape index: {}]   ;;  %s4412_s13 = inlined_call_operand.vmem [shape: f32[2,17,128], index: 13, kind: output, shape index: {}, may-alias: {0,13}]  }
   0x1   :  { %4417 = sst [smem:[#allocation9_spill]] %s4399_s0  ;;  %s3754_s27 = smov 0  }
   0x2   :  { %4418 = sst [smem:[#allocation10_spill]] %s4401_s2  ;;  %s3756_s28 = smov 0  }
   0x3   :  { %4419 = sst [smem:[#allocation11_spill]] %s4402_s3  ;;  %s3758_s29 = smov 0  }
   0x4   :  { %4420 = sst [smem:[#allocation12_spill]] %s4403_s4 }
   0x5   :  { %4421 = sst [smem:[#allocation13_spill]] %s4404_s5 }
   0x6   :  { %4422 = sst [smem:[#allocation14_spill]] %s4412_s13 }
   0x7 LB: > { %4423 = sst [smem:[#allocation3_spill]] %s3657_s25  ;;  %s32_s30 = sadd.s32 1, %s3665_s27  ;;  %s3673_s29 = sphi %s3758_s29, %s23_s29   ;;  %s3669_s28 = sphi %s3756_s28, %s4447_s28   ;;  %s3665_s27 = sphi %s3754_s27, %s4446_s27   ;;  %s3661_s26 = sphi %s3752_s26, %s4445_s26   ;;  %s3657_s25 = sphi %s3750_s25, %s4444_s25  }
   0x8   : > { %4424 = sst [smem:[#allocation4_spill]] %s3665_s27  ;;  %s35_s14 = sadd.s32 1, %s3669_s28 }
   0x9   : > { %4425 = sst [smem:[#allocation5_spill]] %s3669_s28  ;;  %p33_p0 = scmp.ge.s32.totalorder %s32_s30, 2 }
   0xa   : > { %4426 = sst [smem:[#allocation6_spill]] %s3673_s29  ;;  %p2979_p1 = scmp.ge.s32.totalorder %s3673_s29, 1 }
   0xb   : > { %p505_p2 = scmp.lt.s32.totalorder %s3673_s29, 5  ;;  %s4449_s30 = smov (%p33_p0, %s32_s30), 0 }
   0xc   : > { %4427 = sst [smem:[#allocation7_spill]] %s4449_s30  ;;  %s4451_s14 = smov (!%p33_p0, %s35_s14), %s3669_s28 }
   0xd   : > { %p506_p3 = pnand %p2979_p1, %p505_p2  ;;  %p37_p4 = scmp.ge.s32.totalorder %s4451_s14, 2 }
   0xe   : > { %p595_p5 = scmp.lt.s32.totalorder (!%p506_p3), %s3661_s26, 1  ;;  %p600_p6 = scmp.lt.s32.totalorder (!%p506_p3), %s3657_s25, 1 }
   0xf   : > { %s4453_s14 = smov (%p37_p4, %s4451_s14), 0  ;;  %509 = sbr.rel (%p506_p3) target bundleno = 2562 (0xa02), region = 72 }
  0x10   : > { %4428 = sst [smem:[#allocation8_spill]] %s4453_s14 }
  0x11   : > { %s4430_s0 = sld [smem:[#allocation9_spill]] (!%p506_p3) }
  0x12   : > { %s4431_s3 = sld [smem:[#allocation11_spill]] (!%p506_p3) }
  0x13   : > { %s4432_s5 = sld [smem:[#allocation13_spill]] (!%p506_p3) }
  0x14   : > { %s4455_s26 = smov (!%p595_p5, %s3661_s26), 1  ;;  %s4433_s4 = sld [smem:[#allocation12_spill]] }
  0x15   : > { %s3784_s15 = scalar_select %p600_p6, %s3657_s25, 1 }
  0x16   : > { %s3335_s16 = smul.u32 24, %s4455_s26  ;;  %s4435_s17 = sld [smem:[#allocation3_spill]] }
  0x17   : > { %s3336_s30 = smul.u32 192, %s3784_s15  ;;  %s3112_s27 = sshll.u32 %s3784_s15, 6 }
  0x18   : > { %s599_s14 = scalar_lea.vmem %s4430_s0, %s3335_s16  ;;  %s3337_s28 = smul.u32 3, %s3784_s15 }
  0x19   : > { %s3803_s26 = scalar_lea.vmem %s4431_s3, %s3336_s30  ;;  %s3808_s18 = scalar_lea.vmem %s4432_s5, %s3112_s27 }
  0x1a   : > { %s3813_s22 = scalar_lea.vmem %s4433_s4, %s3337_s28  ;;  %s3113_s13 = sshll.u32 %s3784_s15, 8 }
  0x1b   : > { %s2986_s27 = sshll.u32 %s3784_s15, 2  ;;  %s3832_s20 = scalar_lea.vmem %s4408_s9, %s3113_s13 }
  0x1c   : > { %s3837_s23 = scalar_lea.vmem %s4409_s10, %s2986_s27  ;;  %s3842_s0 = scalar_lea.vmem %s4410_s11, %s3113_s13 }
  0x1d   : > { %s645_s30 = scalar_lea.vmem %s4411_s12, %s3784_s15  ;;  %s4434_s4 = sld [smem:[#allocation14_spill]] }
  0x1e   : > { %p2990_p7 = scmp.ne.s32.totalorder %s4435_s17, 0 }
  0x20   : > { %655 = sbr.rel (%p2990_p7) target bundleno = 40 (0x28), region = 76 }
  0x23   : > { %s3851_s5 = scalar_lea.vmem %s4434_s4, %s3335_s16 }
  0x25   : > { %v656_v0 = vld [vmem:[%s599_s14] sm:$0xff]  ;;  %v657_v1 = vld [vmem:[%s599_s14 + $0x8] sm:$0xff]  ;;  %v658_v2 = vld [vmem:[%s599_s14 + $0x10] sm:$0x1] }
  0x26   : > { %659 = vst [vmem:[#allocation2 + $0x10] sm:$0xff] %v656_v0  ;;  %660 = vst [vmem:[#allocation2] sm:$0xff] %v657_v1 }
  0x27   : > { %661 = vst [vmem:[#allocation2 + $0x8] sm:$0x1] %v658_v2 }
  0x28 PF: > { %vm671_vm0 = vcmask 1040384   ;;  %v3428_v7 = vld [vmem:[%s3803_s26 + $0xac] ss:$12 sps:$4 sm:$0xff]   ;;  %v3430_v8 = vld [vmem:[%s3803_s26 + $0xa8] ss:$12 sps:$4 sm:$0xff]   ;;  %v3675_v37 = vmov 0   ;;  %s4436_s14 = scalar_lea.vmem %s4400_s1, %s3784_s15  ;;  %s4439_s21 = scalar_lea.vmem %s4405_s6, %s3784_s15 }
  0x29   : > { %v3431_v9 = vld [vmem:[%s3803_s26 + $0xb0] ss:$12 sps:$4 sm:$0xff]   ;;  %901 = vmatprep.subr.bf16.mxu0 %v3428_v7  ;;  %v3432_v23 = vld [vmem:[%s3803_s26 + $0x94] ss:$12 sps:$4 sm:$0xff]   ;;  %v3435_v25 = vld [vmem:[%s3803_s26 + $0x98] ss:$12 sps:$4 sm:$0xff]   ;;  %933 = vmatprep.mubr.bf16.mxu0 %v3675_v37  ;;  %s4440_s2 = scalar_lea.vmem %s4406_s7, %s3784_s15  ;;  %s4441_s3 = scalar_lea.vmem %s4407_s8, %s3784_s15 }
  0x2a   : > { %3223 = vmatprep.subr.bf16.mxu1 %v3431_v9  ;;  %902 = vmatpush1.bf16.msra.mxu0 %v3430_v8  ;;  %v3434_v24 = vld [vmem:[%s3803_s26 + $0x90] ss:$12 sps:$4 sm:$0xff]   ;;  %v3438_v27 = vld [vmem:[%s3803_s26 + $0x78] ss:$12 sps:$4 sm:$0xff]   ;;  %v3439_v28 = vld [vmem:[%s3803_s26 + $0x80] ss:$12 sps:$4 sm:$0xff]  }
  0x2b   : > { %3224 = vmatpush3.bf16.msra.mxu1 %v3431_v9  ;;  %903 = vmatprep.subr.bf16.mxu0 %v3432_v23  ;;  %v3436_v26 = vld [vmem:[%s3803_s26 + $0x7c] ss:$12 sps:$4 sm:$0xff]   ;;  %v3440_v29 = vld [vmem:[%s3803_s26 + $0x64] ss:$12 sps:$4 sm:$0xff]   ;;  %v3442_v30 = vld [vmem:[%s3803_s26 + $0x60] ss:$12 sps:$4 sm:$0xff]  }
  0x2c   : > { %3225 = vmatprep.subr.bf16.mxu1 %v3435_v25  ;;  %v3443_v31 = vld [vmem:[%s3803_s26 + $0x68] ss:$12 sps:$4 sm:$0xff]   ;;  %v3444_v32 = vld [vmem:[%s3803_s26 + $0x4c] ss:$12 sps:$4 sm:$0xff]   ;;  %v3447_v33 = vld [vmem:[%s3803_s26 + $0x50] ss:$12 sps:$4 sm:$0xff]  }
  0x2d   : > { %v662_v3 = vld [vmem:[#allocation2 + $0x10] sm:$0xff]  ;;  %v663_v5 = vld [vmem:[#allocation2] sm:$0xff]  ;;  %v3452_v39 = vld [vmem:[%s3803_s26 + $0x1c] ss:$12 sps:$4 sm:$0xff]   ;;  %vm1130_vm1 = vcmask 261120   ;;  %s3677_s13 = smov 64  }
  0x2e   : > { %v664_v4 = vld [vmem:[#allocation2 + $0x8] sm:$0x1]  ;;  %667 = vadd.xlane.f32.xlu0 %v662_v3  ;;  %904 = vmatpush1.bf16.msra.mxu0 %v3434_v24  ;;  %v3448_v35 = vld [vmem:[%s3803_s26 + $0x34] ss:$12 sps:$4 sm:$0xff]   ;;  %v3451_v36 = vld [vmem:[%s3803_s26 + $0x38] ss:$12 sps:$4 sm:$0xff]  }
  0x2f   : > { %v672_v6 = vsel %vm671_vm0, %v664_v4, 0.0  ;;  %3226 = vmatpush3.bf16.msra.mxu1 %v3435_v25  ;;  %905 = vmatprep.subr.bf16.mxu0 %v3436_v26  ;;  %v3446_v34 = vld [vmem:[%s3803_s26 + $0x48] ss:$12 sps:$4 sm:$0xff]   ;;  %v3450_v38 = vld [vmem:[%s3803_s26 + $0x30] ss:$12 sps:$4 sm:$0xff]   ;;  %s3678_s27 = smov 32  }
  0x30   : > { %673 = vadd.xlane.f32.xlu1 %v672_v6  ;;  %3227 = vmatprep.subr.bf16.mxu1 %v3439_v28  ;;  %v3455_v40 = vld [vmem:[%s3803_s26 + $0x20] ss:$12 sps:$4 sm:$0xff]   ;;  %v3454_v41 = vld [vmem:[%s3803_s26 + $0x18] ss:$12 sps:$4 sm:$0xff]   ;;  %v3459_v43 = vld [vmem:[%s3803_s26 + $0x8] ss:$12 sps:$4 sm:$0xff]   ;;  %v758_v6 = vlaneseq }
  0x31   : > { %v3456_v42 = vld [vmem:[%s3803_s26 + $0x4] ss:$12 sps:$4 sm:$0xff]   ;;  %v3458_v44 = vld [vmem:[%s3803_s26] ss:$12 sps:$4 sm:$0xff]   ;;  %s4437_s26 = sld [smem:[#allocation10_spill]]  ;;  %vm1378_vm4 = vcmask 131072  }
  0x32   : > { %669 = vadd.xlane.f32.xlu0 %v663_v5  ;;  %906 = vmatpush1.bf16.msra.mxu0 %v3438_v27  ;;  %v2991_v56 = vld [vmem:[%s4436_s14] ss:$0 sm:$0xff]  ;;  %v3908_v7 = vshrl.u32 %v758_v6, 7  ;;  %vm1371_vm6 = vcmask 138240   ;;  %vm1790_vm7 = vcmask 523264   ;;  %vm1794_vm8 = vcmask 785408  }
  0x33   : > { %3228 = vmatpush3.bf16.msra.mxu1 %v3439_v28  ;;  %907 = vmatprep.subr.bf16.mxu0 %v3440_v29  ;;  %v3912_v9 = vld [vmem:[%s3813_s22] sm:$0x7]  ;;  %s3676_s22 = smov 96  }
  0x34   : > { %3229 = vmatprep.subr.bf16.mxu1 %v3443_v31  ;;  %v760_v8 = vsub.s32 0, %v3908_v7 }
  0x36   : > { %908 = vmatpush1.bf16.msra.mxu0 %v3442_v30 }
  0x37   : > { %3230 = vmatpush3.bf16.msra.mxu1 %v3443_v31  ;;  %909 = vmatprep.subr.bf16.mxu0 %v3444_v32  ;;  %s4438_s25 = scalar_lea.vmem %s4437_s26, %s3784_s15  ;;  %s4442_s15 = sld [smem:[#allocation3_spill]] }
  0x38   : > { %3231 = vmatprep.subr.bf16.mxu1 %v3447_v33  ;;  %v2992_v62 = vld [vmem:[%s4438_s25] ss:$0 sm:$0xff] }
  0x3a   : > { %910 = vmatpush1.bf16.msra.mxu0 %v3446_v34 }
  0x3b   : > { %3232 = vmatpush3.bf16.msra.mxu1 %v3447_v33  ;;  %911 = vmatprep.subr.bf16.mxu0 %v3448_v35 }
  0x3c   : > { %3233 = vmatprep.subr.bf16.mxu1 %v3451_v36 }
  0x3d   : > { %p3109_p8 = scmp.ne.s32.totalorder %s4442_s15, 1 }
  0x3e   : > { %912 = vmatpush1.bf16.msra.mxu0 %v3450_v38 }
  0x3f   : > { %3234 = vmatpush3.bf16.msra.mxu1 %v3451_v36  ;;  %913 = vmatprep.subr.bf16.mxu0 %v3452_v39 }
  0x40   : > { %3235 = vmatprep.subr.bf16.mxu1 %v3455_v40 }
  0x42   : > { %914 = vmatpush1.bf16.msra.mxu0 %v3454_v41 }
  0x43   : > { %3236 = vmatpush3.bf16.msra.mxu1 %v3455_v40  ;;  %915 = vmatprep.subr.bf16.mxu0 %v3456_v42 }
  0x44   : > { %3237 = vmatprep.subr.bf16.mxu1 %v3459_v43 }
  0x46   : > { %916 = vmatpush1.bf16.msra.mxu0 %v3458_v44 }
  0x47   : > { %3238 = vmatpush3.bf16.msra.mxu1 %v3459_v43 }
  0xb7   : > { %v668_v10 = vpop.xlane.xlu0 %667 }
  0xb8   : > { %v676_v11 = vmul.f32 0.0078125, %v668_v10  ;;  %v761_v10 = vrot.slane %v3912_v9, %v760_v8 }
  0xb9   : > { %v674_v12 = vpop.xlane.xlu1 %673 }
  0xba   : > { %v678_v13 = vmul.f32 0.0078125, %v674_v12  ;;  %v3858_v14 = vsub.f32 %v662_v3, %v676_v11 }
  0xbb   : > { %v670_v16 = vpop.xlane.xlu0 %669 }
  0xbc   : > { %v3860_v15 = vsub.f32 %v664_v4, %v678_v13  ;;  %v677_v17 = vmul.f32 0.0078125, %v670_v16  ;;  %v682_v18 = vmul.f32 %v3858_v14, %v3858_v14  ;;  %v764_v13 = vsub.s32 1, %v3908_v7 }
  0xbe   : > { %v684_v19 = vmul.f32 %v3860_v15, %v3860_v15  ;;  %v3866_v20 = vsub.f32 %v663_v5, %v677_v17  ;;  %685 = vadd.xlane.f32.xlu1 %v682_v18  ;;  %v765_v18 = vrot.slane %v3912_v9, %v764_v13 }
  0xc0   : > { %v689_v21 = vsel %vm671_vm0, %v684_v19, 0.0  ;;  %v683_v22 = vmul.f32 %v3866_v20, %v3866_v20 }
  0xc2   : > { %690 = vadd.xlane.f32.xlu1 %v689_v21  ;;  %687 = vadd.xlane.f32.xlu0 %v683_v22 }
 0x147   : > { %v686_v45 = vpop.xlane.xlu1 %685 }
 0x148   : > { %v692_v46 = vmul.f32 0.0078125, %v686_v45 }
 0x14a   : > { %v695_v47 = vadd.f32 1e-05, %v692_v46 }
 0x14b   : > { %v691_v48 = vpop.xlane.xlu1 %690  ;;  %v688_v49 = vpop.xlane.xlu0 %687 }
 0x14c   : > { %3548 = vrsqrt.f32 %v695_v47  ;;  %v694_v50 = vmul.f32 0.0078125, %v691_v48  ;;  %v693_v51 = vmul.f32 0.0078125, %v688_v49 }
 0x14e   : > { %v697_v52 = vadd.f32 1e-05, %v694_v50  ;;  %v696_v53 = vadd.f32 1e-05, %v693_v51  ;;  %v768_v50 = vsub.s32 2, %v3908_v7 }
 0x150   : > { %3550 = vrsqrt.f32 %v697_v52 }
 0x151   : > { %3552 = vrsqrt.f32 %v696_v53 }
 0x159   : > { %v3549_v54 = vpop.eup %3548 }
 0x15a   : > { %v701_v55 = vmul.f32 %v3549_v54, %v3858_v14 }
 0x15c   : > { %v710_v61 = vmul.f32 %v2991_v56, %v701_v55 }
 0x15d   : > { %v3551_v57 = vpop.eup %3550 }
 0x15e   : > { %v3553_v58 = vpop.eup %3552  ;;  %v703_v59 = vmul.f32 %v3551_v57, %v3860_v15  ;;  %v719_v2 = vadd.f32 %v2992_v62, %v710_v61  ;;  %v769_v57 = vrot.slane %v3912_v9, %v768_v50 }
 0x15f   : > { %v702_v60 = vmul.f32 %v3553_v58, %v3866_v20 }
 0x160   : > { %v712_v63 = vmul.f32 %v2991_v56, %v703_v59 }
 0x161   : > { %v711_v0 = vmul.f32 %v2991_v56, %v702_v60 }
 0x162   : > { %v721_v1 = vadd.f32 %v2992_v62, %v712_v63 }
 0x163   : > { %v720_v3 = vadd.f32 %v2992_v62, %v711_v0 }
 0x164   : > { %v723_v4 = vpack.c.bf16 %v721_v1, %v721_v1 }
 0x165   : > { %v722_v5 = vpack.c.bf16 %v720_v3, %v719_v2 }
 0x167   : > { %934 = vmatmul.mubr.bf16.vlgmr.msra.gmra.mxu0 %v722_v5  ;;  %3239 = vmatprep.mubr.bf16.mxu1 %v722_v5 }
 0x168   : > { %3240 = vmatmul.mubr.bf16.vlgmr.msra.gmra.mxu1 %v723_v4  ;;  %943 = vmatprep.mubr.bf16.mxu0 %v3675_v37 }
 0x16f   : > { %944 = vmatmul.mubr.bf16.gmra.mxu0 %v723_v4 }
 0x227   : > { %v935_v11 = vpop.f32.mrf.mxu0 }
 0x228   : > { %v3917_v12 = vpop.f32.mrf.mxu1  ;;  %v936_v15 = vadd.f32 %v935_v11, %v761_v10 }
 0x229   : > { %v937_v14 = vpop.f32.mrf.mxu0  ;;  %v3957_v1 = vadd.f32 %v3917_v12, %v769_v57  ;;  %v3966_v12 = vsel %vm671_vm0, 65535, %v3675_v37 }
 0x22a   : > { %v3920_v16 = vpop.f32.mrf.mxu1  ;;  %v1030_v22 = vmul.f32 0.17677669, %v936_v15  ;;  %v938_v28 = vadd.f32 %v937_v14, %v765_v18 }
 0x22b   : > { %v939_v17 = vpop.f32.mrf.mxu0  ;;  %v1514_v11 = vpack.c.bf16 %v3957_v1, %v3957_v1 }
 0x22c   : > { %v940_v19 = vadd.f32 %v939_v17, %v761_v10  ;;  %v3242_v20 = vpop.f32.mrf.mxu1 }
 0x22d   : > { %v941_v21 = vpop.f32.mrf.mxu0 }
 0x22e   : > { %v1031_v23 = vmul.f32 0.17677669, %v940_v19  ;;  %v942_v24 = vadd.f32 %v941_v21, %v765_v18 }
 0x22f   : > { %v945_v25 = vpop.f32.mrf.mxu0 }
 0x230   : > { %1047 = vrot.lane.b32.xlu1 %v942_v24, %s3676_s22  ;;  %v1114_v26 = vpack.c.bf16 %v1031_v23, %v1030_v22  ;;  %v1122_v35 = vpack.c.bf16 %v942_v24, %v938_v28  ;;  %v946_v36 = vadd.f32 %v945_v25, %v761_v10  ;;  %v989_v22 = vpop.f32.mrf.mxu1 }
 0x231   : > { %v947_v27 = vpop.f32.mrf.mxu0 }
 0x232   : > { %v948_v29 = vadd.f32 %v947_v27, %v765_v18  ;;  %3247 = vmatprep.mubr.msk.bf16.mxu1 %vm1130_vm1, %v1114_v26  ;;  %v1138_v38 = vsel %vm1130_vm1, %v1122_v35, 0  ;;  %v1032_v39 = vmul.f32 0.17677669, %v946_v36 }
 0x233   : > { %v949_v30 = vpop.f32.mrf.mxu0 }
 0x234   : > { %1003 = vrot.lane.b32.xlu1 %v936_v15, %s3676_s22  ;;  %v1123_v31 = vpack.c.bf16 %v948_v29, %v948_v29  ;;  %v3383_v32 = vpack.i.bf16 %v938_v28, %v948_v29  ;;  %v1115_v40 = vpack.c.bf16 %v1032_v39, %v1032_v39  ;;  %v3973_v29 = vadd.f32 %v989_v22, %v769_v57 }
 0x235   : > { %v950_v33 = vpop.f32.mrf.mxu0 }
 0x236   : > { %3327 = vmatprep.subr.msk.bf16.mxu1 %vm1130_vm1, %v1123_v31  ;;  %3384 = vrot.lane.b32.xlu0 %v3383_v32, %s3676_s22  ;;  %v1141_v34 = vsel %vm1130_vm1, %v1123_v31, 0 }
 0x237   : > { %3244 = vmatpush3.bf16.xpose.msra.mxu1 %v1141_v34 }
 0x238   : > { %3328 = vmatprep.subr.msk.bf16.mxu1 %vm1130_vm1, %v1122_v35  ;;  %1005 = vrot.lane.b32.xlu1 %v940_v19, %s3676_s22 }
 0x23a   : > { %1007 = vrot.lane.b32.xlu0 %v946_v36, %s3676_s22 }
 0x23c   : > { %3389 = vrot.lane.b32.xlu1 %v3383_v32, %s3677_s13 }
 0x23e   : > { %3394 = vrot.lane.b32.xlu0 %v3383_v32, %s3678_s27  ;;  %v3977_v32 = vadd.f32 %v3920_v16, %v769_v57  ;;  %v1105_v16 = vadd.s32 16, %v3908_v7 }
 0x23f   : > { %3246 = vmatpush3.bf16.xpose.msra.mxu1 %v1138_v38 }
 0x240   : > { %1056 = vrot.lane.b32.xlu1 %v942_v24, %s3677_s13  ;;  %v1513_v35 = vpack.c.bf16 %v3973_v29, %v3977_v32 }
 0x242   : > { %1065 = vrot.lane.b32.xlu0 %v942_v24, %s3678_s27  ;;  %v1530_v24 = vand.u32 %v3966_v12, %v1514_v11 }
 0x244   : > { %1012 = vrot.lane.b32.xlu1 %v936_v15, %s3677_s13 }
 0x246   : > { %1014 = vrot.lane.b32.xlu0 %v940_v19, %s3677_s13  ;;  %3248 = vmatmul.mubr.msk.bf16.vlgmr.msra.gmra.mxu1 %vm1130_vm1, %v1115_v40 }
 0x248   : > { %1016 = vrot.lane.b32.xlu1 %v946_v36, %s3677_s13 }
 0x24a   : > { %1021 = vrot.lane.b32.xlu0 %v936_v15, %s3678_s27 }
 0x24c   : > { %1023 = vrot.lane.b32.xlu1 %v940_v19, %s3678_s27 }
 0x24e   : > { %1025 = vrot.lane.b32.xlu0 %v946_v36, %s3678_s27 }
 0x2a2   : > { %v1048_v41 = vpop.permute.xlu1 %1047 }
 0x2a6   : > { %v1004_v42 = vpop.permute.xlu1 %1003 }
 0x2a7   : > { %v1033_v47 = vmul.f32 0.17677669, %v1004_v42  ;;  %v1104_v42 = vadd.s32 8, %v3908_v7 }
 0x2a8   : > { %v3385_v43 = vpop.permute.xlu0 %3384 }
 0x2a9   : > { %v3387_v44 = vunpack.i.h.bf16 %v3385_v43  ;;  %v3386_v45 = vunpack.i.l.bf16 %v3385_v43  ;;  %v3679_v43 = vmov -1e+30  }
 0x2aa   : > { %v1006_v46 = vpop.permute.xlu1 %1005 }
 0x2ab   : > { %v1125_v48 = vpack.c.bf16 %v3386_v45, %v3386_v45  ;;  %v1034_v49 = vmul.f32 0.17677669, %v1006_v46  ;;  %v1124_v52 = vpack.c.bf16 %v1048_v41, %v3387_v44  ;;  %v1107_v41 = vand.u32 127, %v758_v6 }
 0x2ac   : > { %v1008_v51 = vpop.permute.xlu0 %1007 }
 0x2ad   : > { %v1116_v53 = vpack.c.bf16 %v1034_v49, %v1033_v47  ;;  %3329 = vmatprep.subr.msk.bf16.mxu1 %vm1130_vm1, %v1125_v48  ;;  %v1201_v54 = vsel %vm1130_vm1, %v1125_v48, 0  ;;  %v1198_v4 = vsel %vm1130_vm1, %v1124_v52, 0  ;;  %v1035_v9 = vmul.f32 0.17677669, %v1008_v51 }
 0x2ae   : > { %v3390_v55 = vpop.permute.xlu1 %3389  ;;  %3252 = vmatpush3.bf16.xpose.msra.mxu1 %v1201_v54  ;;  %vm1110_vm2 = vcmp.le.s32.totalorder %v1107_v41, %v1105_v16  ;;  %vm1108_vm3 = vcmp.le.s32.totalorder %v1107_v41, %v3908_v7  ;;  %vm1109_vm5 = vcmp.le.s32.totalorder %v1107_v41, %v1104_v42 }
 0x2af   : > { %v3391_v56 = vunpack.i.l.bf16 %v3390_v55  ;;  %3330 = vmatprep.subr.msk.bf16.mxu1 %vm1130_vm1, %v1124_v52  ;;  %3255 = vmatprep.mubr.msk.bf16.mxu1 %vm1130_vm1, %v1116_v53  ;;  %v3392_v59 = vunpack.i.h.bf16 %v3390_v55  ;;  %v1117_v18 = vpack.c.bf16 %v1035_v9, %v1035_v9  ;;  %v1113_v44 = vsel %vm1110_vm2, 0.0, %v3679_v43 }
 0x2b0   : > { %v3395_v58 = vpop.permute.xlu0 %3394  ;;  %v1111_v46 = vsel %vm1108_vm3, 0.0, %v3679_v43  ;;  %v1112_v52 = vsel %vm1109_vm5, 0.0, %v3679_v43 }
 0x2b1   : > { %v1127_v60 = vpack.c.bf16 %v3391_v56, %v3391_v56  ;;  %v3396_v61 = vunpack.i.l.bf16 %v3395_v58  ;;  %v3397_v19 = vunpack.i.h.bf16 %v3395_v58 }
 0x2b2   : > { %v1057_v62 = vpop.permute.xlu1 %1056 }
 0x2b3   : > { %v1126_v63 = vpack.c.bf16 %v1057_v62, %v3392_v59  ;;  %3331 = vmatprep.subr.msk.bf16.mxu0 %vm1130_vm1, %v1127_v60  ;;  %v1261_v0 = vsel %vm1130_vm1, %v1127_v60, 0  ;;  %v1129_v3 = vpack.c.bf16 %v3396_v61, %v3396_v61 }
 0x2b4   : > { %v1066_v2 = vpop.permute.xlu0 %1065  ;;  %3260 = vmatpush3.bf16.xpose.msra.mxu0 %v1261_v0 }
 0x2b5   : > { %3332 = vmatprep.subr.msk.bf16.mxu0 %vm1130_vm1, %v1126_v63  ;;  %v1258_v20 = vsel %vm1130_vm1, %v1126_v63, 0  ;;  %v1128_v25 = vpack.c.bf16 %v1066_v2, %v3397_v19  ;;  %v1321_v27 = vsel %vm1130_vm1, %v1129_v3, 0 }
 0x2b6   : > { %v1013_v5 = vpop.permute.xlu1 %1012  ;;  %3254 = vmatpush3.bf16.xpose.msra.mxu1 %v1198_v4 }
 0x2b7   : > { %3333 = vmatprep.subr.msk.bf16.mxu1 %vm1130_vm1, %v1129_v3  ;;  %v1036_v14 = vmul.f32 0.17677669, %v1013_v5  ;;  %v1318_v38 = vsel %vm1130_vm1, %v1128_v25, 0 }
 0x2b8   : > { %v1015_v10 = vpop.permute.xlu0 %1014 }
 0x2b9   : > { %v1037_v15 = vmul.f32 0.17677669, %v1015_v10 }
 0x2ba   : > { %v1017_v17 = vpop.permute.xlu1 %1016 }
 0x2bb   : > { %v1118_v21 = vpack.c.bf16 %v1037_v15, %v1036_v14  ;;  %v1038_v26 = vmul.f32 0.17677669, %v1017_v17 }
 0x2bc   : > { %v1022_v23 = vpop.permute.xlu0 %1021  ;;  %3262 = vmatpush3.bf16.xpose.msra.mxu0 %v1258_v20 }
 0x2bd   : > { %3256 = vmatmul.mubr.msk.bf16.vlgmr.msra.gmra.mxu1 %vm1130_vm1, %v1117_v18  ;;  %3263 = vmatprep.mubr.msk.bf16.mxu0 %vm1130_vm1, %v1118_v21  ;;  %v1039_v30 = vmul.f32 0.17677669, %v1022_v23  ;;  %v1119_v33 = vpack.c.bf16 %v1038_v26, %v1038_v26 }
 0x2be   : > { %3275 = vmatprep.subr.bf16.mxu0 %v1530_v24  ;;  %v1024_v28 = vpop.permute.xlu1 %1023  ;;  %3268 = vmatpush3.bf16.xpose.msra.mxu1 %v1321_v27  ;;  %v3398_v27 = vpack.i.bf16 %v3977_v32, %v3957_v1 }
 0x2bf   : > { %v1040_v31 = vmul.f32 0.17677669, %v1024_v28  ;;  %3334 = vmatprep.subr.msk.bf16.mxu1 %vm1130_vm1, %v1128_v25 }
 0x2c0   : > { %v1026_v36 = vpop.permute.xlu0 %1025 }
 0x2c1   : > { %v1120_v34 = vpack.c.bf16 %v1040_v31, %v1039_v30  ;;  %v1041_v39 = vmul.f32 0.17677669, %v1026_v36 }
 0x2c3   : > { %3264 = vmatmul.mubr.msk.bf16.vlgmr.msra.gmra.mxu0 %vm1130_vm1, %v1119_v33  ;;  %3271 = vmatprep.mubr.msk.bf16.mxu1 %vm1130_vm1, %v1120_v34  ;;  %v1121_v40 = vpack.c.bf16 %v1041_v39, %v1041_v39 }
 0x2c4   : > { %3276 = vmatpush3.bf16.msra.mxu0 %v1530_v24 }
 0x2c5   : > { %3277 = vmatprep.subr.bf16.mxu0 %v1513_v35 }
 0x2c6   : > { %3270 = vmatpush3.bf16.xpose.msra.mxu1 %v1318_v38 }
 0x2c8   : > { %3278 = vmatpush3.bf16.msra.mxu0 %v1513_v35 }
 0x2cd   : > { %3272 = vmatmul.mubr.msk.bf16.vlgmr.msra.gmra.mxu1 %vm1130_vm1, %v1121_v40 }
 0x306   : > { %v3249_v45 = vpop.f32.mrf.mxu1 }
 0x307   : > { %v3989_v47 = vadd.f32 %v3249_v45, %v1113_v44 }
 0x308   : > { %v1177_v48 = vpop.f32.mrf.mxu1 }
 0x309   : > { %v3991_v49 = vadd.f32 %v1177_v48, %v1111_v46  ;;  %v1379_v6 = vsel %vm1378_vm4, %v3989_v47, -inf }
 0x30a   : > { %1380 = vmax.xlane.f32.xlu0 %v1379_v6  ;;  %v3250_v51 = vpop.f32.mrf.mxu1 }
 0x30b   : > { %v1372_v53 = vsel %vm1371_vm6, %v3991_v49, -inf }
 0x30c   : > { %v1180_v54 = vpop.f32.mrf.mxu1  ;;  %1373 = vmax.xlane.f32.xlu1 %v1372_v53 }
 0x30d   : > { %v1181_v55 = vadd.f32 %v1180_v54, %v1112_v52 }
 0x30f   : > { %v1375_v56 = vsel %vm1371_vm6, %v1181_v55, -inf }
 0x310   : > { %1376 = vmax.xlane.f32.xlu0 %v1375_v56 }
 0x37d   : > { %v3257_v57 = vpop.f32.mrf.mxu1 }
 0x37e   : > { %v3998_v58 = vadd.f32 %v3257_v57, %v1113_v44 }
 0x37f   : > { %v1237_v59 = vpop.f32.mrf.mxu1 }
 0x380   : > { %v4000_v60 = vadd.f32 %v1237_v59, %v1111_v46  ;;  %v1388_v61 = vsel %vm1378_vm4, %v3998_v58, -inf }
 0x381   : > { %v3258_v62 = vpop.f32.mrf.mxu1  ;;  %1389 = vmax.xlane.f32.xlu0 %v1388_v61 }
 0x382   : > { %v1382_v2 = vsel %vm1371_vm6, %v4000_v60, -inf }
 0x383   : > { %v3265_v63 = vpop.f32.mrf.mxu0  ;;  %v1240_v9 = vpop.f32.mrf.mxu1 }
 0x384   : > { %v4004_v0 = vadd.f32 %v3265_v63, %v1113_v44  ;;  %v4012_v14 = vadd.f32 %v1240_v9, %v1112_v52 }
 0x385   : > { %v1297_v3 = vpop.f32.mrf.mxu0  ;;  %1383 = vmax.xlane.f32.xlu0 %v1382_v2 }
 0x386   : > { %v4008_v4 = vadd.f32 %v1297_v3, %v1111_v46  ;;  %v1397_v5 = vsel %vm1378_vm4, %v4004_v0, -inf  ;;  %v1385_v20 = vsel %vm1371_vm6, %v4012_v14, -inf }
 0x387   : > { %v3266_v10 = vpop.f32.mrf.mxu0  ;;  %1398 = vmax.xlane.f32.xlu1 %v1397_v5 }
 0x388   : > { %v1391_v17 = vsel %vm1371_vm6, %v4008_v4, -inf }
 0x389   : > { %v1300_v11 = vpop.f32.mrf.mxu0 }
 0x38a   : > { %v4014_v15 = vadd.f32 %v1300_v11, %v1112_v52 }
 0x38b   : > { %1392 = vmax.xlane.f32.xlu1 %v1391_v17 }
 0x38c   : > { %v1394_v18 = vsel %vm1371_vm6, %v4014_v15, -inf }
 0x38d   : > { %v3273_v19 = vpop.f32.mrf.mxu1  ;;  %1395 = vmax.xlane.f32.xlu0 %v1394_v18 }
 0x38e   : > { %v4024_v24 = vadd.f32 %v3273_v19, %v1113_v44 }
 0x38f   : > { %v1357_v21 = vpop.f32.mrf.mxu1  ;;  %1386 = vmax.xlane.f32.xlu1 %v1385_v20 }
 0x390   : > { %v4022_v22 = vadd.f32 %v1357_v21, %v1111_v46  ;;  %v1406_v26 = vsel %vm1378_vm4, %v4024_v24, -inf }
 0x391   : > { %v3274_v23 = vpop.f32.mrf.mxu1 }
 0x392   : > { %v1400_v25 = vsel %vm1371_vm6, %v4022_v22, -inf }
 0x393   : > { %1401 = vmax.xlane.f32.xlu0 %v1400_v25  ;;  %v1381_v28 = vpop.xlane.xlu0 %1380  ;;  %v1360_v34 = vpop.f32.mrf.mxu1 }
 0x394   : > { %v4035_v35 = vadd.f32 %v1360_v34, %v1112_v52  ;;  %v1411_v40 = vsub.f32 %v3989_v47, %v1381_v28 }
 0x395   : > { %v1374_v16 = vpop.xlane.xlu1 %1373 }
 0x396   : > { %v1403_v36 = vsel %vm1371_vm6, %v4035_v35, -inf  ;;  %v1425_v41 = vmul.f32 1.442695, %v1411_v40  ;;  %v1409_v42 = vsub.f32 %v3991_v49, %v1374_v16 }
 0x397   : > { %1407 = vmax.xlane.f32.xlu0 %v1406_v26 }
 0x398   : > { %v1421_v43 = vmul.f32 1.442695, %v1409_v42 }
 0x399   : > { %v1377_v30 = vpop.xlane.xlu0 %1376 }
 0x39a   : > { %v1410_v31 = vsub.f32 %v1181_v55, %v1377_v30 }
 0x39c   : > { %v1423_v33 = vmul.f32 1.442695, %v1410_v31 }
 0x39e   : > { %3554 = vpow2.f32 %v1423_v33 }
 0x39f   : > { %3556 = vpow2.f32 %v1425_v41  ;;  %v3408_v41 = vpack.i.bf16 %v3973_v29, %v3977_v32 }
 0x3a0   : > { %3399 = vrot.lane.b32.xlu1 %v3398_v27, %s3676_s22  ;;  %3558 = vpow2.f32 %v1421_v43 }
 0x3ab   : > { %v4039_v38 = vpop.eup %3554 }
 0x3ac   : > { %v1448_v39 = vsel %vm1371_vm6, %v4039_v38, 0.0  ;;  %v4048_v44 = vpop.eup %3556 }
 0x3ad   : > { %1077 = vrot.lane.b32.xlu0 %v3973_v29, %s3676_s22  ;;  %v1451_v45 = vsel %vm1378_vm4, %v4048_v44, 0.0  ;;  %v4052_v46 = vpop.eup %3558 }
 0x3c4   : > { %1404 = vmax.xlane.f32.xlu1 %v1403_v36 }
 0x3cc   : > { %1449 = vadd.xlane.f32.xlu0 %v1448_v39 }
 0x3d5   : > { %3404 = vrot.lane.b32.xlu1 %v3398_v27, %s3677_s13 }
 0x3d9   : > { %1097 = vrot.lane.b32.xlu1 %v3957_v1, %s3678_s27  ;;  %v1445_v1 = vsel %vm1371_vm6, %v4052_v46, 0.0 }
 0x3fd   : > { %1452 = vadd.xlane.f32.xlu1 %v1451_v45 }
 0x401   : > { %1446 = vadd.xlane.f32.xlu1 %v1445_v1 }
 0x40a   : > { %v1390_v47 = vpop.xlane.xlu0 %1389 }
 0x40b   : > { %v1414_v48 = vsub.f32 %v3998_v58, %v1390_v47 }
 0x40d   : > { %v1431_v6 = vmul.f32 1.442695, %v1414_v48 }
 0x40e   : > { %v1384_v49 = vpop.xlane.xlu0 %1383 }
 0x40f   : > { %3560 = vpow2.f32 %v1431_v6  ;;  %v1412_v51 = vsub.f32 %v4000_v60, %v1384_v49 }
 0x410   : > { %v1399_v52 = vpop.xlane.xlu1 %1398 }
 0x411   : > { %v1427_v53 = vmul.f32 1.442695, %v1412_v51  ;;  %v1417_v54 = vsub.f32 %v4004_v0, %v1399_v52 }
 0x413   : > { %3562 = vpow2.f32 %v1427_v53  ;;  %v1437_v55 = vmul.f32 1.442695, %v1417_v54 }
 0x414   : > { %v1393_v56 = vpop.xlane.xlu1 %1392 }
 0x415   : > { %3564 = vpow2.f32 %v1437_v55  ;;  %v1415_v57 = vsub.f32 %v4008_v4, %v1393_v56 }
 0x416   : > { %v1396_v59 = vpop.xlane.xlu0 %1395 }
 0x417   : > { %v1433_v61 = vmul.f32 1.442695, %v1415_v57  ;;  %v1416_v62 = vsub.f32 %v4014_v15, %v1396_v59 }
 0x418   : > { %v1387_v58 = vpop.xlane.xlu1 %1386 }
 0x419   : > { %3566 = vpow2.f32 %v1433_v61  ;;  %v1435_v63 = vmul.f32 1.442695, %v1416_v62  ;;  %v1413_v2 = vsub.f32 %v4012_v14, %v1387_v58 }
 0x41b   : > { %3568 = vpow2.f32 %v1435_v63  ;;  %v1429_v60 = vmul.f32 1.442695, %v1413_v2 }
 0x41c   : > { %v4062_v3 = vpop.eup %3560  ;;  %v1402_v0 = vpop.xlane.xlu0 %1401 }
 0x41d   : > { %v3400_v5 = vpop.permute.xlu1 %3399  ;;  %3570 = vpow2.f32 %v1429_v60  ;;  %v1460_v4 = vsel %vm1378_vm4, %v4062_v3, 0.0  ;;  %v1418_v10 = vsub.f32 %v4022_v22, %v1402_v0 }
 0x41e   : > { %v3401_v9 = vunpack.i.l.bf16 %v3400_v5  ;;  %1461 = vadd.xlane.f32.xlu0 %v1460_v4  ;;  %v3402_v23 = vunpack.i.h.bf16 %v3400_v5 }
 0x41f   : > { %v1439_v21 = vmul.f32 1.442695, %v1418_v10 }
 0x420   : > { %v1516_v11 = vpack.c.bf16 %v3401_v9, %v3401_v9  ;;  %v4067_v15 = vpop.eup %3562  ;;  %v1408_v17 = vpop.xlane.xlu0 %1407 }
 0x421   : > { %v1420_v14 = vsub.f32 %v4024_v24, %v1408_v17  ;;  %v1454_v18 = vsel %vm1371_vm6, %v4067_v15, 0.0 }
 0x422   : > { %v1587_v19 = vand.u32 %v3966_v12, %v1516_v11  ;;  %v4073_v20 = vpop.eup %3564  ;;  %1455 = vadd.xlane.f32.xlu0 %v1454_v18 }
 0x423   : > { %v1443_v25 = vmul.f32 1.442695, %v1420_v14  ;;  %v1469_v22 = vsel %vm1378_vm4, %v4073_v20, 0.0 }
 0x424   : > { %3283 = vmatprep.subr.bf16.mxu1 %v1587_v19  ;;  %v1078_v26 = vpop.permute.xlu0 %1077  ;;  %1470 = vadd.xlane.f32.xlu1 %v1469_v22 }
 0x425   : > { %3284 = vmatpush3.bf16.msra.mxu1 %v1587_v19  ;;  %3572 = vpow2.f32 %v1443_v25  ;;  %v1515_v24 = vpack.c.bf16 %v1078_v26, %v3402_v23 }
 0x426   : > { %v4077_v27 = vpop.eup %3566  ;;  %3574 = vpow2.f32 %v1439_v21 }
 0x427   : > { %3285 = vmatprep.subr.bf16.mxu1 %v1515_v24  ;;  %v1463_v28 = vsel %vm1371_vm6, %v4077_v27, 0.0 }
 0x428   : > { %v4081_v30 = vpop.eup %3568  ;;  %1464 = vadd.xlane.f32.xlu1 %v1463_v28 }
 0x429   : > { %3286 = vmatpush3.bf16.msra.mxu1 %v1515_v24  ;;  %v1466_v31 = vsel %vm1371_vm6, %v4081_v30, 0.0 }
 0x42a   : > { %v4085_v33 = vpop.eup %3570  ;;  %1467 = vadd.xlane.f32.xlu0 %v1466_v31 }
 0x42b   : > { %v1457_v34 = vsel %vm1371_vm6, %v4085_v33, 0.0 }
 0x42c   : > { %1458 = vadd.xlane.f32.xlu1 %v1457_v34 }
 0x432   : > { %v4089_v36 = vpop.eup %3572 }
 0x433   : > { %v1478_v39 = vsel %vm1378_vm4, %v4089_v36, 0.0  ;;  %v4093_v40 = vpop.eup %3574 }
 0x434   : > { %1479 = vadd.xlane.f32.xlu0 %v1478_v39  ;;  %v1472_v16 = vsel %vm1371_vm6, %v4093_v40, 0.0 }
 0x438   : > { %1473 = vadd.xlane.f32.xlu0 %v1472_v16 }
 0x44d   : > { %v1405_v42 = vpop.xlane.xlu1 %1404 }
 0x44e   : > { %v1419_v43 = vsub.f32 %v4035_v35, %v1405_v42  ;;  %3409 = vrot.lane.b32.xlu0 %v3408_v41, %s3678_s27 }
 0x450   : > { %v1441_v45 = vmul.f32 1.442695, %v1419_v43 }
 0x451   : > { %v4101_v1 = vpop.permute.xlu1 %3404 }
 0x452   : > { %3576 = vpow2.f32 %v1441_v45  ;;  %v3406_v47 = vunpack.i.l.bf16 %v4101_v1 }
 0x454   : > { %v1518_v48 = vpack.c.bf16 %v3406_v47, %v3406_v47 }
 0x455   : > { %v1098_v6 = vpop.permute.xlu1 %1097  ;;  %v1450_v53 = vpop.xlane.xlu0 %1449 }
 0x456   : > { %v1520_v49 = vpack.c.bf16 %v1098_v6, %v1098_v6  ;;  %v1644_v51 = vand.u32 %v3966_v12, %v1518_v48 }
 0x458   : > { %v1701_v52 = vand.u32 %v3966_v12, %v1520_v49  ;;  %3291 = vmatprep.subr.bf16.mxu0 %v1644_v51 }
 0x45a   : > { %3299 = vmatprep.subr.bf16.mxu1 %v1701_v52 }
 0x45f   : > { %v4106_v32 = vpop.eup %3576 }
 0x460   : > { %v1475_v35 = vsel %vm1371_vm6, %v4106_v32, 0.0 }
 0x461   : > { %1476 = vadd.xlane.f32.xlu1 %v1475_v35  ;;  %v3462_v35 = vld [vmem:[%s3808_s18 + $0x28] sm:$0xff]  }
 0x472   : > { %1086 = vrot.lane.b32.xlu1 %v3973_v29, %s3677_s13 }
 0x486   : > { %v1453_v54 = vpop.xlane.xlu1 %1452 }
 0x487   : > { %3578 = vrcp.f32 %v1453_v54 }
 0x488   : > { %3580 = vrcp.f32 %v1450_v53 }
 0x48a   : > { %v1447_v55 = vpop.xlane.xlu1 %1446 }
 0x48b   : > { %3582 = vrcp.f32 %v1447_v55 }
 0x494   : > { %v3579_v56 = vpop.eup %3578 }
 0x495   : > { %v3581_v57 = vpop.eup %3580  ;;  %v1495_v59 = vmul.f32 %v3579_v56, %v4048_v44  ;;  %v3463_v56 = vld [vmem:[%s3808_s18 + $0x20] sm:$0xff]  }
 0x496   : > { %v1494_v62 = vmul.f32 %v3581_v57, %v4039_v38  ;;  %v3464_v57 = vld [vmem:[%s3808_s18 + $0x18] sm:$0xff]  }
 0x497   : > { %v1506_v63 = vpack.c.bf16 %v1495_v59, %v1495_v59  ;;  %v3465_v59 = vld [vmem:[%s3808_s18 + $0x10] sm:$0xff]  }
 0x498   : > { %v3583_v12 = vpop.eup %3582 }
 0x499   : > { %v1493_v61 = vmul.f32 %v3583_v12, %v4052_v46 }
 0x49b   : > { %v1505_v58 = vpack.c.bf16 %v1494_v62, %v1493_v61  ;;  %v3466_v61 = vld [vmem:[%s3808_s18 + $0x8] sm:$0xff]  }
 0x49d   : > { %3279 = vmatprep.mubr.msk.bf16.mxu0 %vm1371_vm6, %v1505_v58 }
 0x49e   : > { %3280 = vmatmul.mubr.msk.bf16.vlgmr.msra.gmra.mxu0 %vm1371_vm6, %v1506_v63 }
 0x49f   : > { %3292 = vmatpush3.bf16.msra.mxu0 %v1644_v51 }
 0x4a7   : > { %v1462_v29 = vpop.xlane.xlu0 %1461 }
 0x4a8   : > { %3584 = vrcp.f32 %v1462_v29  ;;  %v3467_v29 = vld [vmem:[%s3808_s18] sm:$0xff]  }
 0x4ab   : > { %v1456_v60 = vpop.xlane.xlu0 %1455 }
 0x4ad   : > { %v1471_v2 = vpop.xlane.xlu1 %1470 }
 0x4b1   : > { %v1465_v0 = vpop.xlane.xlu1 %1464 }
 0x4b2   : > { %3586 = vrcp.f32 %v1465_v0 }
 0x4b3   : > { %3588 = vrcp.f32 %v1456_v60  ;;  %v1468_v5 = vpop.xlane.xlu0 %1467 }
 0x4b4   : > { %3590 = vrcp.f32 %v1468_v5 }
 0x4b5   : > { %v1459_v44 = vpop.xlane.xlu1 %1458  ;;  %v3585_v38 = vpop.eup %3584 }
 0x4b6   : > { %3592 = vrcp.f32 %v1459_v44  ;;  %v1498_v19 = vmul.f32 %v3585_v38, %v4062_v3 }
 0x4b7   : > { %3594 = vrcp.f32 %v1471_v2 }
 0x4b8   : > { %v1508_v31 = vpack.c.bf16 %v1498_v19, %v1498_v19 }
 0x4bd   : > { %v1480_v46 = vpop.xlane.xlu0 %1479 }
 0x4be   : > { %3596 = vrcp.f32 %v1480_v46 }
 0x4bf   : > { %v3587_v9 = vpop.eup %3586 }
 0x4c0   : > { %v3589_v4 = vpop.eup %3588  ;;  %v1499_v17 = vmul.f32 %v3587_v9, %v4077_v27  ;;  %v3407_v27 = vunpack.i.h.bf16 %v4101_v1 }
 0x4c1   : > { %v3591_v10 = vpop.eup %3590  ;;  %v1474_v11 = vpop.xlane.xlu0 %1473  ;;  %v1496_v23 = vmul.f32 %v3589_v4, %v4067_v15 }
 0x4c2   : > { %v1500_v14 = vmul.f32 %v3591_v10, %v4081_v30  ;;  %3598 = vrcp.f32 %v1474_v11 }
 0x4c3   : > { %v3593_v18 = vpop.eup %3592 }
 0x4c4   : > { %v1509_v21 = vpack.c.bf16 %v1500_v14, %v1499_v17  ;;  %v1497_v25 = vmul.f32 %v3593_v18, %v4085_v33  ;;  %v3595_v15 = vpop.eup %3594 }
 0x4c5   : > { %v3410_v22 = vpop.permute.xlu0 %3409  ;;  %v1501_v39 = vmul.f32 %v3595_v15, %v4073_v20 }
 0x4c6   : > { %v3412_v26 = vunpack.i.h.bf16 %v3410_v22  ;;  %v3411_v24 = vunpack.i.l.bf16 %v3410_v22  ;;  %3295 = vmatprep.mubr.msk.bf16.mxu0 %vm1371_vm6, %v1509_v21  ;;  %v1507_v28 = vpack.c.bf16 %v1497_v25, %v1496_v23 }
 0x4c7   : > { %v1510_v16 = vpack.c.bf16 %v1501_v39, %v1501_v39 }
 0x4c8   : > { %v1519_v34 = vpack.c.bf16 %v3412_v26, %v3411_v24  ;;  %3287 = vmatprep.mubr.msk.bf16.mxu1 %vm1371_vm6, %v1507_v28 }
 0x4c9   : > { %3288 = vmatmul.mubr.msk.bf16.vlgmr.msra.gmra.mxu1 %vm1371_vm6, %v1508_v31 }
 0x4ca   : > { %3300 = vmatpush3.bf16.msra.mxu1 %v1701_v52  ;;  %v3460_v52 = vld [vmem:[%s3808_s18 + $0x38] sm:$0xff]  }
 0x4cb   : > { %3301 = vmatprep.subr.bf16.mxu1 %v1519_v34  ;;  %v3597_v41 = vpop.eup %3596 }
 0x4cc   : > { %v1504_v45 = vmul.f32 %v3597_v41, %v4089_v36  ;;  %v3461_v36 = vld [vmem:[%s3808_s18 + $0x30] sm:$0xff]   ;;  %v3033_v41 = vld [vmem:[%s4439_s21] ss:$0 sm:$0xff] }
 0x4ce   : > { %3302 = vmatpush3.bf16.msra.mxu1 %v1519_v34  ;;  %v1512_v6 = vpack.c.bf16 %v1504_v45, %v1504_v45 }
 0x4cf   : > { %v3599_v42 = vpop.eup %3598 }
 0x4d0   : > { %v1502_v47 = vmul.f32 %v3599_v42, %v4093_v40 }
 0x4ea   : > { %v1477_v3 = vpop.xlane.xlu1 %1476 }
 0x4eb   : > { %3600 = vrcp.f32 %v1477_v3 }
 0x4ee   : > { %v1087_v30 = vpop.permute.xlu1 %1086 }
 0x4ef   : > { %v1517_v33 = vpack.c.bf16 %v1087_v30, %v3407_v27 }
 0x4f1   : > { %3293 = vmatprep.subr.bf16.mxu0 %v1517_v33 }
 0x4f2   : > { %3294 = vmatpush3.bf16.msra.mxu0 %v1517_v33 }
 0x4f3   : > { %3307 = vmatprep.subr.bf16.mxu0 %v3460_v52 }
 0x4f5   : > { %3296 = vmatmul.mubr.msk.bf16.vlgmr.msra.gmra.mxu0 %vm1371_vm6, %v1510_v16 }
 0x4f6   : > { %3308 = vmatpush3.bf16.msra.mxu0 %v3460_v52  ;;  %v3634_v52 = vld [vmem:[#allocation2 + $0x8] sm:$0x1] }
 0x4f7   : > { %3309 = vmatprep.subr.bf16.mxu0 %v3461_v36 }
 0x4f8   : > { %v3601_v43 = vpop.eup %3600 }
 0x4f9   : > { %v1503_v1 = vmul.f32 %v3601_v43, %v4106_v32 }
 0x4fa   : > { %3310 = vmatpush3.bf16.msra.mxu0 %v3461_v36 }
 0x4fb   : > { %v1511_v48 = vpack.c.bf16 %v1503_v1, %v1502_v47  ;;  %3311 = vmatprep.subr.bf16.mxu0 %v3462_v35  ;;  %v3632_v47 = vld [vmem:[#allocation2 + $0x10] sm:$0xff] }
 0x4fd   : > { %3303 = vmatprep.mubr.msk.bf16.mxu1 %vm1371_vm6, %v1511_v48 }
 0x4fe   : > { %3304 = vmatmul.mubr.msk.bf16.vlgmr.msra.gmra.mxu1 %vm1371_vm6, %v1512_v6  ;;  %3312 = vmatpush3.bf16.msra.mxu0 %v3462_v35  ;;  %v3470_v35 = vld [vmem:[%s3832_s20 + $0xe4] ss:$16 sps:$4 sm:$0xff]  }
 0x4ff   : > { %2225 = vmatprep.mubr.bf16.mxu1 %v3675_v37  ;;  %3313 = vmatprep.subr.bf16.mxu0 %v3463_v56 }
 0x500   : > { %2193 = vmatprep.subr.bf16.mxu1 %v3470_v35 }
 0x502   : > { %3314 = vmatpush3.bf16.msra.mxu0 %v3463_v56 }
 0x503   : > { %3315 = vmatprep.subr.bf16.mxu0 %v3464_v57 }
 0x506   : > { %3316 = vmatpush3.bf16.msra.mxu0 %v3464_v57 }
 0x507   : > { %3317 = vmatprep.subr.bf16.mxu0 %v3465_v59 }
 0x50a   : > { %3318 = vmatpush3.bf16.msra.mxu0 %v3465_v59 }
 0x50b   : > { %3319 = vmatprep.subr.bf16.mxu0 %v3466_v61 }
 0x50e   : > { %3320 = vmatpush3.bf16.msra.mxu0 %v3466_v61 }
 0x50f   : > { %3321 = vmatprep.subr.bf16.mxu0 %v3467_v29 }
 0x512   : > { %3322 = vmatpush3.bf16.msra.mxu0 %v3467_v29 }
 0x55e   : > { %v3281_v20 = vpop.f32.mrf.mxu0 }
 0x560   : > { %v4134_v49 = vpop.f32.mrf.mxu0 }
 0x562   : > { %v3282_v51 = vpop.f32.mrf.mxu0 }
 0x564   : > { %v1569_v12 = vpop.f32.mrf.mxu0 }
 0x589   : > { %v3289_v40 = vpop.f32.mrf.mxu1 }
 0x58a   : > { %1758 = vrot.lane.b32.xlu0 %v3289_v40, %s3678_s27 }
 0x58b   : > { %v1623_v32 = vpop.f32.mrf.mxu1 }
 0x58d   : > { %v3290_v53 = vpop.f32.mrf.mxu1 }
 0x58e   : > { %v3471_v53 = vld [vmem:[%s3832_s20 + $0xe8] ss:$16 sps:$4 sm:$0xff]  }
 0x58f   : > { %v1626_v54 = vpop.f32.mrf.mxu1 }
 0x590   : > { %v3413_v55 = vpack.i.bf16 %v1626_v54, %v1623_v32  ;;  %v3468_v32 = vld [vmem:[%s3832_s20 + $0xe0] ss:$16 sps:$4 sm:$0xff]   ;;  %v3473_v54 = vld [vmem:[%s3832_s20 + $0xec] ss:$16 sps:$4 sm:$0xff]  }
 0x591   : > { %2244 = vmatprep.subr.bf16.mxu0 %v3473_v54  ;;  %2194 = vmatpush1.bf16.msra.mxu1 %v3468_v32  ;;  %v3042_v32 = vld [vmem:[%s4440_s2] ss:$0 sm:$0xff] }
 0x592   : > { %3414 = vrot.lane.b32.xlu1 %v3413_v55, %s3678_s27 }
 0x5b5   : > { %v3297_v62 = vpop.f32.mrf.mxu0 }
 0x5b6   : > { %1770 = vrot.lane.b32.xlu0 %v3297_v62, %s3677_s13 }
 0x5b7   : > { %v1680_v58 = vpop.f32.mrf.mxu0 }
 0x5b9   : > { %v3298_v63 = vpop.f32.mrf.mxu0 }
 0x5bb   : > { %v1683_v2 = vpop.f32.mrf.mxu0 }
 0x5bc   : > { %v3418_v60 = vpack.i.bf16 %v1683_v2, %v1680_v58 }
 0x5be   : > { %3419 = vrot.lane.b32.xlu1 %v3418_v60, %s3677_s13  ;;  %v3305_v0 = vpop.f32.mrf.mxu1 }
 0x5bf   : > { %1782 = vrot.lane.b32.xlu0 %v3305_v0, %s3676_s22 }
 0x5c0   : > { %v1737_v5 = vpop.f32.mrf.mxu1 }
 0x5c2   : > { %v3306_v44 = vpop.f32.mrf.mxu1 }
 0x5c3   : > { %v3479_v44 = vld [vmem:[%s3832_s20 + $0xcc] ss:$16 sps:$4 sm:$0xff]  }
 0x5c4   : > { %v1740_v46 = vpop.f32.mrf.mxu1 }
 0x5c5   : > { %v3423_v38 = vpack.i.bf16 %v1740_v46, %v1737_v5  ;;  %v3476_v5 = vld [vmem:[%s3832_s20 + $0xc4] ss:$16 sps:$4 sm:$0xff]   ;;  %v3474_v46 = vld [vmem:[%s3832_s20 + $0xc0] ss:$16 sps:$4 sm:$0xff]  }
 0x5c6   : > { %2195 = vmatprep.subr.bf16.mxu1 %v3476_v5  ;;  %v3519_v5 = vld [vmem:[%s3842_s0 + $0xb8] sm:$0xff]  }
 0x5c7   : > { %3424 = vrot.lane.b32.xlu1 %v3423_v38, %s3676_s22  ;;  %v3477_v38 = vld [vmem:[%s3832_s20 + $0xc8] ss:$16 sps:$4 sm:$0xff]   ;;  %2196 = vmatpush1.bf16.msra.mxu1 %v3474_v46  ;;  %v3522_v46 = vld [vmem:[%s3842_s0 + $0x30] sm:$0xff]  }
 0x5fc   : > { %v1759_v9 = vpop.permute.xlu0 %1758 }
 0x5fd   : > { %v1789_v23 = vsel %vm1130_vm1, %v3281_v20, %v1759_v9  ;;  %v3482_v9 = vld [vmem:[%s3832_s20 + $0xa4] ss:$16 sps:$4 sm:$0xff]  }
 0x5fe   : > { %2197 = vmatprep.subr.bf16.mxu1 %v3482_v9  ;;  %v3524_v9 = vld [vmem:[%s3842_s0 + $0x68] sm:$0xff]  }
 0x604   : > { %v3415_v4 = vpop.permute.xlu1 %3414 }
 0x605   : > { %v3417_v17 = vunpack.i.h.bf16 %v3415_v4  ;;  %v3416_v14 = vunpack.i.l.bf16 %v3415_v4  ;;  %v3485_v4 = vld [vmem:[%s3832_s20 + $0xac] ss:$16 sps:$4 sm:$0xff]  }
 0x607   : > { %v1788_v25 = vsel %vm1130_vm1, %v1569_v12, %v3417_v17  ;;  %v1787_v26 = vsel %vm1130_vm1, %v4134_v49, %v3416_v14  ;;  %v3633_v49 = vld [vmem:[#allocation2] sm:$0xff]  ;;  %v3491_v14 = vld [vmem:[%s3832_s20 + $0x8c] ss:$16 sps:$4 sm:$0xff]  }
 0x608   : > { %v3488_v17 = vld [vmem:[%s3832_s20 + $0x84] ss:$16 sps:$4 sm:$0xff]  }
 0x628   : > { %v1771_v10 = vpop.permute.xlu0 %1770 }
 0x629   : > { %v1793_v24 = vsel %vm1790_vm7, %v1789_v23, %v1771_v10  ;;  %v3480_v10 = vld [vmem:[%s3832_s20 + $0xa0] ss:$16 sps:$4 sm:$0xff]   ;;  %v3494_v23 = vld [vmem:[%s3832_s20 + $0x64] ss:$16 sps:$4 sm:$0xff]  }
 0x62a   : > { %2198 = vmatpush1.bf16.msra.mxu1 %v3480_v10  ;;  %v3526_v10 = vld [vmem:[%s3842_s0 + $0x28] sm:$0xff]  }
 0x62b   : > { %2199 = vmatprep.subr.bf16.mxu1 %v3488_v17  ;;  %v3528_v17 = vld [vmem:[%s3842_s0 + $0x60] sm:$0xff]  }
 0x630   : > { %v3420_v11 = vpop.permute.xlu1 %3419 }
 0x631   : > { %v3422_v18 = vunpack.i.h.bf16 %v3420_v11  ;;  %v3421_v19 = vunpack.i.l.bf16 %v3420_v11  ;;  %v1783_v21 = vpop.permute.xlu0 %1782  ;;  %v3483_v11 = vld [vmem:[%s3832_s20 + $0xa8] ss:$16 sps:$4 sm:$0xff]  }
 0x632   : > { %v1797_v15 = vsel %vm1794_vm8, %v1793_v24, %v1783_v21  ;;  %v3492_v21 = vld [vmem:[%s3832_s20 + $0x60] ss:$16 sps:$4 sm:$0xff]   ;;  %v3503_v24 = vld [vmem:[%s3832_s20 + $0x4c] ss:$16 sps:$4 sm:$0xff]  }
 0x633   : > { %v1791_v34 = vsel %vm1790_vm7, %v1787_v26, %v3421_v19  ;;  %v1792_v3 = vsel %vm1790_vm7, %v1788_v25, %v3422_v18  ;;  %v1799_v39 = vpack.c.bf16 %v1797_v15, %v1797_v15  ;;  %v3486_v18 = vld [vmem:[%s3832_s20 + $0x80] ss:$16 sps:$4 sm:$0xff]   ;;  %v3489_v19 = vld [vmem:[%s3832_s20 + $0x88] ss:$16 sps:$4 sm:$0xff]   ;;  %v3500_v26 = vld [vmem:[%s3832_s20 + $0x44] ss:$16 sps:$4 sm:$0xff]  }
 0x634   : > { %2200 = vmatpush1.bf16.msra.mxu1 %v3486_v18  ;;  %v3495_v25 = vld [vmem:[%s3832_s20 + $0x68] ss:$16 sps:$4 sm:$0xff]   ;;  %v3504_v15 = vld [vmem:[%s3832_s20 + $0x20] ss:$16 sps:$4 sm:$0xff]  }
 0x635   : > { %2201 = vmatprep.subr.bf16.mxu1 %v3494_v23  ;;  %v3530_v18 = vld [vmem:[%s3842_s0 + $0x20] sm:$0xff]   ;;  %v3533_v23 = vld [vmem:[%s3842_s0 + $0xd8] sm:$0xff]  }
 0x638   : > { %2202 = vmatpush1.bf16.msra.mxu1 %v3492_v21  ;;  %v3532_v21 = vld [vmem:[%s3842_s0 + $0x58] sm:$0xff]  }
 0x639   : > { %v3425_v22 = vpop.permute.xlu1 %3424  ;;  %2203 = vmatprep.subr.bf16.mxu1 %v3500_v26  ;;  %v3536_v26 = vld [vmem:[%s3842_s0 + $0x50] sm:$0xff]  }
 0x63a   : > { %v3427_v28 = vunpack.i.h.bf16 %v3425_v22  ;;  %v3426_v31 = vunpack.i.l.bf16 %v3425_v22  ;;  %v3497_v22 = vld [vmem:[%s3832_s20 + $0x6c] ss:$16 sps:$4 sm:$0xff]  }
 0x63c   : > { %v1795_v27 = vsel %vm1794_vm8, %v1791_v34, %v3426_v31  ;;  %v1796_v30 = vsel %vm1794_vm8, %v1792_v3, %v3427_v28  ;;  %v3498_v28 = vld [vmem:[%s3832_s20 + $0x40] ss:$16 sps:$4 sm:$0xff]   ;;  %v3501_v31 = vld [vmem:[%s3832_s20 + $0x48] ss:$16 sps:$4 sm:$0xff]   ;;  %v3506_v34 = vld [vmem:[%s3832_s20 + $0x24] ss:$16 sps:$4 sm:$0xff]  }
 0x63d   : > { %v1798_v33 = vpack.c.bf16 %v1796_v30, %v1795_v27  ;;  %v3509_v3 = vld [vmem:[%s3832_s20 + $0x2c] ss:$16 sps:$4 sm:$0xff]   ;;  %2204 = vmatpush1.bf16.msra.mxu1 %v3498_v28  ;;  %v3507_v27 = vld [vmem:[%s3832_s20 + $0x28] ss:$16 sps:$4 sm:$0xff]   ;;  %v3512_v30 = vld [vmem:[%s3832_s20 + $0x4] ss:$16 sps:$4 sm:$0xff]  }
 0x63e   : > { %2205 = vmatprep.subr.bf16.mxu1 %v3506_v34  ;;  %v3538_v28 = vld [vmem:[%s3842_s0 + $0x10] sm:$0xff]   ;;  %v3540_v34 = vld [vmem:[%s3842_s0 + $0x48] sm:$0xff]  }
 0x63f   : > { %3323 = vmatprep.mubr.bf16.mxu0 %v1798_v33  ;;  %v3515_v33 = vld [vmem:[%s3832_s20 + $0xc] ss:$16 sps:$4 sm:$0xff]  }
 0x640   : > { %3324 = vmatmul.mubr.bf16.vlgmr.msra.gmra.mxu0 %v1799_v39  ;;  %v3510_v39 = vld [vmem:[%s3832_s20] ss:$16 sps:$4 sm:$0xff]  }
 0x641   : > { %2276 = vmatprep.mubr.bf16.mxu0 %v3675_v37  ;;  %2245 = vmatpush1.bf16.msra.mxu0 %v3471_v53 }
 0x642   : > { %2246 = vmatprep.subr.bf16.mxu0 %v3479_v44  ;;  %2206 = vmatpush1.bf16.msra.mxu1 %v3504_v15  ;;  %v3520_v44 = vld [vmem:[%s3842_s0 + $0x70] sm:$0xff]   ;;  %v3542_v15 = vld [vmem:[%s3842_s0 + $0x8] sm:$0xff]  }
 0x643   : > { %2207 = vmatprep.subr.bf16.mxu1 %v3512_v30  ;;  %v3544_v30 = vld [vmem:[%s3842_s0 + $0x40] sm:$0xff]  }
 0x645   : > { %2247 = vmatpush1.bf16.msra.mxu0 %v3477_v38  ;;  %v3523_v38 = vld [vmem:[%s3842_s0 + $0xb0] sm:$0xff]  }
 0x646   : > { %2248 = vmatprep.subr.bf16.mxu0 %v3485_v4  ;;  %2208 = vmatpush1.bf16.msra.mxu1 %v3510_v39  ;;  %v3525_v4 = vld [vmem:[%s3842_s0 + $0xe8] sm:$0xff]   ;;  %v3546_v39 = vld [vmem:[%s3842_s0] sm:$0xff]  }
 0x649   : > { %2249 = vmatpush1.bf16.msra.mxu0 %v3483_v11  ;;  %v3527_v11 = vld [vmem:[%s3842_s0 + $0xa8] sm:$0xff]  }
 0x64a   : > { %2250 = vmatprep.subr.bf16.mxu0 %v3491_v14  ;;  %v3529_v14 = vld [vmem:[%s3842_s0 + $0xe0] sm:$0xff]  }
 0x64d   : > { %2251 = vmatpush1.bf16.msra.mxu0 %v3489_v19  ;;  %v3531_v19 = vld [vmem:[%s3842_s0 + $0xa0] sm:$0xff]  }
 0x64e   : > { %2252 = vmatprep.subr.bf16.mxu0 %v3497_v22  ;;  %v3535_v22 = vld [vmem:[%s3842_s0 + $0x98] sm:$0xff]  }
 0x651   : > { %2253 = vmatpush1.bf16.msra.mxu0 %v3495_v25  ;;  %v3534_v25 = vld [vmem:[%s3842_s0 + $0x18] sm:$0xff]  }
 0x652   : > { %2254 = vmatprep.subr.bf16.mxu0 %v3503_v24  ;;  %v3537_v24 = vld [vmem:[%s3842_s0 + $0xd0] sm:$0xff]  }
 0x655   : > { %2255 = vmatpush1.bf16.msra.mxu0 %v3501_v31  ;;  %v3539_v31 = vld [vmem:[%s3842_s0 + $0x90] sm:$0xff]  }
 0x656   : > { %2256 = vmatprep.subr.bf16.mxu0 %v3509_v3  ;;  %v3541_v3 = vld [vmem:[%s3842_s0 + $0xc8] sm:$0xff]  }
 0x659   : > { %2257 = vmatpush1.bf16.msra.mxu0 %v3507_v27  ;;  %v3543_v27 = vld [vmem:[%s3842_s0 + $0x88] sm:$0xff]  }
 0x65a   : > { %2258 = vmatprep.subr.bf16.mxu0 %v3515_v33  ;;  %v3545_v33 = vld [vmem:[%s3842_s0 + $0xc0] sm:$0xff]  }
 0x700   : > { %v3325_v16 = vpop.f32.mrf.mxu0 }
 0x701   : > { %v1914_v48 = vadd.f32 %v3325_v16, %v3033_v41  ;;  %v3513_v16 = vld [vmem:[%s3832_s20 + $0x8] ss:$16 sps:$4 sm:$0xff]  }
 0x702   : > { %v1905_v42 = vpop.f32.mrf.mxu0  ;;  %2259 = vmatpush1.bf16.msra.mxu0 %v3513_v16  ;;  %v3547_v16 = vld [vmem:[%s3842_s0 + $0x80] sm:$0xff]  }
 0x703   : > { %v1906_v43 = vadd.f32 %v3033_v41, %v1905_v42  ;;  %v4165_v36 = vadd.f32 %v3634_v52, %v1914_v48 }
 0x704   : > { %v3326_v45 = vpop.f32.mrf.mxu0 }
 0x705   : > { %v4160_v1 = vadd.f32 %v3632_v47, %v1906_v43  ;;  %v1928_v40 = vsel %vm671_vm0, %v4165_v36, 0.0 }
 0x706   : > { %v1908_v6 = vpop.f32.mrf.mxu0 }
 0x707   : > { %v1909_v20 = vadd.f32 %v3033_v41, %v1908_v6  ;;  %1924 = vadd.xlane.f32.xlu1 %v4160_v1 }
 0x709   : > { %v4163_v51 = vadd.f32 %v3633_v49, %v1909_v20 }
 0x70b   : > { %1926 = vadd.xlane.f32.xlu0 %v4163_v51 }
 0x70f   : > { %1929 = vadd.xlane.f32.xlu0 %v1928_v40 }
 0x790   : > { %v1925_v55 = vpop.xlane.xlu1 %1924 }
 0x791   : > { %v1931_v56 = vmul.f32 0.0078125, %v1925_v55  ;;  %v3043_v55 = vld [vmem:[%s4441_s3] ss:$0 sm:$0xff] }
 0x793   : > { %v4175_v57 = vsub.f32 %v4160_v1, %v1931_v56 }
 0x794   : > { %v1927_v12 = vpop.xlane.xlu0 %1926 }
 0x795   : > { %v1932_v59 = vmul.f32 0.0078125, %v1927_v12  ;;  %v1937_v61 = vmul.f32 %v4175_v57, %v4175_v57 }
 0x797   : > { %v4180_v62 = vsub.f32 %v4163_v51, %v1932_v59  ;;  %1940 = vadd.xlane.f32.xlu0 %v1937_v61 }
 0x798   : > { %v1930_v58 = vpop.xlane.xlu0 %1929 }
 0x799   : > { %v1933_v63 = vmul.f32 0.0078125, %v1930_v58  ;;  %v1938_v29 = vmul.f32 %v4180_v62, %v4180_v62 }
 0x79b   : > { %v4185_v2 = vsub.f32 %v4165_v36, %v1933_v63  ;;  %1942 = vadd.xlane.f32.xlu1 %v1938_v29 }
 0x79d   : > { %v1939_v60 = vmul.f32 %v4185_v2, %v4185_v2 }
 0x79f   : > { %v1944_v0 = vsel %vm671_vm0, %v1939_v60, 0.0  ;;  %v3516_v60 = vld [vmem:[%s3842_s0 + $0x78] sm:$0xff]  }
 0x7a0   : > { %1945 = vadd.xlane.f32.xlu0 %v1944_v0  ;;  %v3517_v0 = vld [vmem:[%s3842_s0 + $0xf8] sm:$0xff]   ;;  %3167 = vmatprep.subr.bf16.mxu1 %v3516_v60 }
 0x7a1   : > { %3195 = vmatprep.subr.bf16.mxu0 %v3517_v0 }
 0x820   : > { %v1941_v41 = vpop.xlane.xlu0 %1940 }
 0x821   : > { %v1947_v42 = vmul.f32 0.0078125, %v1941_v41  ;;  %v2011_v41 = vld [vmem:[%s3837_s23] sm:$0xf] }
 0x823   : > { %v1950_v43 = vadd.f32 1e-05, %v1947_v42  ;;  %v2027_v42 = vsub.s32 3, %v3908_v7 }
 0x824   : > { %v1943_v45 = vpop.xlane.xlu1 %1942 }
 0x825   : > { %3602 = vrsqrt.f32 %v1950_v43  ;;  %v1948_v47 = vmul.f32 0.0078125, %v1943_v45  ;;  %v2016_v43 = vrot.slane %v2011_v41, %v760_v8  ;;  %v4271_v45 = vrot.slane %v2011_v41, %v768_v50 }
 0x827   : > { %v1951_v48 = vadd.f32 1e-05, %v1948_v47  ;;  %v4275_v47 = vrot.slane %v2011_v41, %v764_v13 }
 0x829   : > { %3604 = vrsqrt.f32 %v1951_v48  ;;  %v1946_v6 = vpop.xlane.xlu0 %1945  ;;  %v4277_v48 = vrot.slane %v2011_v41, %v2027_v42 }
 0x82a   : > { %v1949_v20 = vmul.f32 0.0078125, %v1946_v6 }
 0x82c   : > { %v1952_v49 = vadd.f32 1e-05, %v1949_v20 }
 0x82e   : > { %3606 = vrsqrt.f32 %v1952_v49 }
 0x832   : > { %v3603_v52 = vpop.eup %3602 }
 0x833   : > { %v1956_v40 = vmul.f32 %v3603_v52, %v4175_v57 }
 0x835   : > { %v1965_v54 = vmul.f32 %v3042_v32, %v1956_v40 }
 0x836   : > { %v3605_v35 = vpop.eup %3604 }
 0x837   : > { %v1957_v53 = vmul.f32 %v3605_v35, %v4180_v62  ;;  %v1974_v57 = vadd.f32 %v3043_v55, %v1965_v54 }
 0x839   : > { %v1966_v56 = vmul.f32 %v3042_v32, %v1957_v53 }
 0x83b   : > { %v3607_v12 = vpop.eup %3606  ;;  %v1975_v59 = vadd.f32 %v3043_v55, %v1966_v56 }
 0x83c   : > { %v1958_v61 = vmul.f32 %v3607_v12, %v4185_v2  ;;  %v3518_v2 = vld [vmem:[%s3842_s0 + $0x38] sm:$0xff]  }
 0x83d   : > { %v1977_v58 = vpack.c.bf16 %v1975_v59, %v1974_v57 }
 0x83e   : > { %v1967_v63 = vmul.f32 %v3042_v32, %v1958_v61 }
 0x83f   : > { %2226 = vmatmul.mubr.bf16.vlgmr.msra.gmra.mxu1 %v1977_v58  ;;  %2277 = vmatmul.mubr.bf16.vlgmr.msra.gmra.mxu0 %v1977_v58 }
 0x840   : > { %2235 = vmatprep.mubr.bf16.mxu1 %v3675_v37  ;;  %2286 = vmatprep.mubr.bf16.mxu0 %v3675_v37  ;;  %v1976_v62 = vadd.f32 %v3043_v55, %v1967_v63  ;;  %v3521_v37 = vld [vmem:[%s3842_s0 + $0xf0] sm:$0xff]  }
 0x841   : > { %3168 = vmatpush3.bf16.msra.mxu1 %v3518_v2  ;;  %3196 = vmatpush3.bf16.msra.mxu0 %v3519_v5 }
 0x842   : > { %v1978_v29 = vpack.c.bf16 %v1976_v62, %v1976_v62  ;;  %3169 = vmatprep.subr.bf16.mxu1 %v3520_v44  ;;  %3197 = vmatprep.subr.bf16.mxu0 %v3521_v37 }
 0x845   : > { %3170 = vmatpush3.bf16.msra.mxu1 %v3522_v46  ;;  %3198 = vmatpush3.bf16.msra.mxu0 %v3523_v38 }
 0x846   : > { %3171 = vmatprep.subr.bf16.mxu1 %v3524_v9  ;;  %3199 = vmatprep.subr.bf16.mxu0 %v3525_v4 }
 0x847   : > { %2236 = vmatmul.mubr.bf16.gmra.mxu1 %v1978_v29  ;;  %2287 = vmatmul.mubr.bf16.gmra.mxu0 %v1978_v29 }
 0x849   : > { %3172 = vmatpush3.bf16.msra.mxu1 %v3526_v10  ;;  %3200 = vmatpush3.bf16.msra.mxu0 %v3527_v11 }
 0x84a   : > { %3173 = vmatprep.subr.bf16.mxu1 %v3528_v17  ;;  %3201 = vmatprep.subr.bf16.mxu0 %v3529_v14 }
 0x84d   : > { %3174 = vmatpush3.bf16.msra.mxu1 %v3530_v18  ;;  %3202 = vmatpush3.bf16.msra.mxu0 %v3531_v19 }
 0x84e   : > { %3175 = vmatprep.subr.bf16.mxu1 %v3532_v21  ;;  %3203 = vmatprep.subr.bf16.mxu0 %v3533_v23 }
 0x851   : > { %3176 = vmatpush3.bf16.msra.mxu1 %v3534_v25  ;;  %3204 = vmatpush3.bf16.msra.mxu0 %v3535_v22 }
 0x852   : > { %3177 = vmatprep.subr.bf16.mxu1 %v3536_v26  ;;  %3205 = vmatprep.subr.bf16.mxu0 %v3537_v24 }
 0x855   : > { %3178 = vmatpush3.bf16.msra.mxu1 %v3538_v28  ;;  %3206 = vmatpush3.bf16.msra.mxu0 %v3539_v31 }
 0x856   : > { %3179 = vmatprep.subr.bf16.mxu1 %v3540_v34  ;;  %3207 = vmatprep.subr.bf16.mxu0 %v3541_v3 }
 0x859   : > { %3180 = vmatpush3.bf16.msra.mxu1 %v3542_v15  ;;  %3208 = vmatpush3.bf16.msra.mxu0 %v3543_v27 }
 0x85a   : > { %3181 = vmatprep.subr.bf16.mxu1 %v3544_v30  ;;  %3209 = vmatprep.subr.bf16.mxu0 %v3545_v33 }
 0x85d   : > { %3182 = vmatpush3.bf16.msra.mxu1 %v3546_v39  ;;  %3210 = vmatpush3.bf16.msra.mxu0 %v3547_v16 }
 0x8ff   : > { %v2227_v6 = vpop.f32.mrf.mxu1  ;;  %v2278_v20 = vpop.f32.mrf.mxu0 }
 0x900   : > { %v4279_v49 = vadd.f32 %v2227_v6, %v2016_v43  ;;  %v4282_v52 = vadd.f32 %v2278_v20, %v4271_v45 }
 0x901   : > { %v2229_v40 = vpop.f32.mrf.mxu1  ;;  %v2280_v32 = vpop.f32.mrf.mxu0 }
 0x902   : > { %v2295_v8 = vmul.f32 %v4279_v49, %v4279_v49  ;;  %v2297_v50 = vmul.f32 %v4282_v52, %v4282_v52  ;;  %v4289_v7 = vadd.f32 %v2229_v40, %v4275_v47  ;;  %v4292_v13 = vadd.f32 %v2280_v32, %v4277_v48 }
 0x903   : > { %v2231_v35 = vpop.f32.mrf.mxu1  ;;  %v2282_v53 = vpop.f32.mrf.mxu0 }
 0x904   : > { %v2307_v54 = vmul.f32 %v2295_v8, %v4279_v49  ;;  %v2309_v55 = vmul.f32 %v2297_v50, %v4282_v52  ;;  %v2296_v56 = vmul.f32 %v4289_v7, %v4289_v7  ;;  %v2298_v12 = vmul.f32 %v4292_v13, %v4292_v13 }
 0x905   : > { %v4300_v57 = vadd.f32 %v2231_v35, %v2016_v43  ;;  %v4303_v59 = vadd.f32 %v2282_v53, %v4271_v45  ;;  %v2233_v61 = vpop.f32.mrf.mxu1  ;;  %v2284_v58 = vpop.f32.mrf.mxu0 }
 0x906   : > { %v2319_v63 = vmul.f32 0.044715, %v2307_v54  ;;  %v2321_v62 = vmul.f32 0.044715, %v2309_v55  ;;  %v2308_v29 = vmul.f32 %v2296_v56, %v4289_v7  ;;  %v2310_v60 = vmul.f32 %v2298_v12, %v4292_v13 }
 0x907   : > { %v2299_v0 = vmul.f32 %v4300_v57, %v4300_v57  ;;  %v2301_v2 = vmul.f32 %v4303_v59, %v4303_v59  ;;  %v4312_v5 = vadd.f32 %v2233_v61, %v4275_v47  ;;  %v4315_v44 = vadd.f32 %v2284_v58, %v4277_v48  ;;  %v2237_v37 = vpop.f32.mrf.mxu1  ;;  %v2288_v46 = vpop.f32.mrf.mxu0 }
 0x908   : > { %v2331_v38 = vadd.f32 %v2319_v63, %v4279_v49  ;;  %v2333_v9 = vadd.f32 %v2321_v62, %v4282_v52  ;;  %v2320_v4 = vmul.f32 0.044715, %v2308_v29  ;;  %v2322_v10 = vmul.f32 0.044715, %v2310_v60 }
 0x909   : > { %v2311_v11 = vmul.f32 %v2299_v0, %v4300_v57  ;;  %v2313_v17 = vmul.f32 %v2301_v2, %v4303_v59  ;;  %v2300_v14 = vmul.f32 %v4312_v5, %v4312_v5  ;;  %v2302_v18 = vmul.f32 %v4315_v44, %v4315_v44  ;;  %v2239_v19 = vpop.f32.mrf.mxu1  ;;  %v2290_v21 = vpop.f32.mrf.mxu0 }
 0x90a   : > { %v2343_v23 = vmul.f32 0.7978846, %v2331_v38  ;;  %v2345_v25 = vmul.f32 0.7978846, %v2333_v9  ;;  %v2332_v22 = vadd.f32 %v2320_v4, %v4289_v7  ;;  %v2334_v26 = vadd.f32 %v2322_v10, %v4292_v13 }
 0x90b   : > { %v2323_v24 = vmul.f32 0.044715, %v2311_v11  ;;  %v2325_v28 = vmul.f32 0.044715, %v2313_v17  ;;  %v2312_v31 = vmul.f32 %v2300_v14, %v4312_v5  ;;  %v2314_v34 = vmul.f32 %v2302_v18, %v4315_v44  ;;  %v2241_v3 = vpop.f32.mrf.mxu1  ;;  %v2292_v15 = vpop.f32.mrf.mxu0 }
 0x90c   : > { %3608 = vtanh.f32 %v2343_v23  ;;  %v2344_v27 = vmul.f32 0.7978846, %v2332_v22  ;;  %v2346_v30 = vmul.f32 0.7978846, %v2334_v26  ;;  %v4329_v33 = vadd.f32 %v2237_v37, %v2016_v43 }
 0x90d   : > { %3610 = vtanh.f32 %v2345_v25  ;;  %v2335_v39 = vadd.f32 %v2323_v24, %v4300_v57  ;;  %v2337_v16 = vadd.f32 %v2325_v28, %v4303_v59  ;;  %v2324_v41 = vmul.f32 0.044715, %v2312_v31  ;;  %v2242_v42 = vpop.f32.mrf.mxu1  ;;  %v2293_v6 = vpop.f32.mrf.mxu0 }
 0x90e   : > { %3612 = vtanh.f32 %v2344_v27  ;;  %v2326_v20 = vmul.f32 0.044715, %v2314_v34  ;;  %v2303_v40 = vmul.f32 %v4329_v33, %v4329_v33  ;;  %v4336_v32 = vadd.f32 %v2288_v46, %v4271_v45 }
 0x90f   : > { %3614 = vtanh.f32 %v2346_v30  ;;  %v2347_v8 = vmul.f32 0.7978846, %v2335_v39  ;;  %v2349_v43 = vmul.f32 0.7978846, %v2337_v16  ;;  %v2336_v50 = vadd.f32 %v2324_v41, %v4312_v5 }
 0x910   : > { %v2338_v35 = vadd.f32 %v2326_v20, %v4315_v44  ;;  %v2315_v53 = vmul.f32 %v2303_v40, %v4329_v33  ;;  %v2305_v54 = vmul.f32 %v4336_v32, %v4336_v32  ;;  %v4344_v55 = vadd.f32 %v2239_v19, %v4275_v47 }
 0x911   : > { %3616 = vtanh.f32 %v2347_v8  ;;  %v2348_v56 = vmul.f32 0.7978846, %v2336_v50  ;;  %v4347_v45 = vadd.f32 %v2290_v21, %v4277_v48 }
 0x912   : > { %3618 = vtanh.f32 %v2349_v43  ;;  %v2350_v12 = vmul.f32 0.7978846, %v2338_v35  ;;  %v2327_v61 = vmul.f32 0.044715, %v2315_v53  ;;  %v2317_v58 = vmul.f32 %v2305_v54, %v4336_v32 }
 0x913   : > { %3620 = vtanh.f32 %v2348_v56  ;;  %v2304_v63 = vmul.f32 %v4344_v55, %v4344_v55  ;;  %v2306_v62 = vmul.f32 %v4347_v45, %v4347_v45 }
 0x914   : > { %3622 = vtanh.f32 %v2350_v12  ;;  %v2339_v47 = vadd.f32 %v2327_v61, %v4329_v33  ;;  %v2329_v29 = vmul.f32 0.044715, %v2317_v58 }
 0x915   : > { %v2316_v60 = vmul.f32 %v2304_v63, %v4344_v55  ;;  %v2318_v48 = vmul.f32 %v2306_v62, %v4347_v45 }
 0x916   : > { %v2351_v0 = vmul.f32 0.7978846, %v2339_v47  ;;  %v2341_v2 = vadd.f32 %v2329_v29, %v4336_v32 }
 0x917   : > { %v2328_v37 = vmul.f32 0.044715, %v2316_v60  ;;  %v2330_v46 = vmul.f32 0.044715, %v2318_v48 }
 0x918   : > { %3624 = vtanh.f32 %v2351_v0  ;;  %v2353_v38 = vmul.f32 0.7978846, %v2341_v2 }
 0x919   : > { %v3609_v9 = vpop.eup %3608  ;;  %v2340_v4 = vadd.f32 %v2328_v37, %v4344_v55  ;;  %v2342_v10 = vadd.f32 %v2330_v46, %v4347_v45 }
 0x91a   : > { %v3611_v11 = vpop.eup %3610  ;;  %3626 = vtanh.f32 %v2353_v38  ;;  %v2367_v25 = vadd.f32 1.0, %v3609_v9 }
 0x91b   : > { %v3613_v17 = vpop.eup %3612  ;;  %v2352_v14 = vmul.f32 0.7978846, %v2340_v4  ;;  %v2354_v18 = vmul.f32 0.7978846, %v2342_v10  ;;  %v2369_v24 = vadd.f32 1.0, %v3611_v11 }
 0x91c   : > { %v3615_v19 = vpop.eup %3614  ;;  %v2368_v21 = vadd.f32 1.0, %v3613_v17  ;;  %v2379_v39 = vmul.f32 0.5, %v2367_v25 }
 0x91d   : > { %3628 = vtanh.f32 %v2352_v14  ;;  %v2370_v22 = vadd.f32 1.0, %v3615_v19  ;;  %v2381_v6 = vmul.f32 0.5, %v2369_v24 }
 0x91e   : > { %v3617_v23 = vpop.eup %3616  ;;  %3630 = vtanh.f32 %v2354_v18  ;;  %v2380_v30 = vmul.f32 0.5, %v2368_v21  ;;  %v2391_v54 = vmul.f32 %v2379_v39, %v4279_v49 }
 0x91f   : > { %v3619_v26 = vpop.eup %3618  ;;  %v2371_v28 = vadd.f32 1.0, %v3617_v23  ;;  %v2382_v42 = vmul.f32 0.5, %v2370_v22  ;;  %v2393_v63 = vmul.f32 %v2381_v6, %v4282_v52 }
 0x920   : > { %v3621_v31 = vpop.eup %3620  ;;  %v2373_v34 = vadd.f32 1.0, %v3619_v26  ;;  %v2392_v35 = vmul.f32 %v2380_v30, %v4289_v7 }
 0x921   : > { %v3623_v3 = vpop.eup %3622  ;;  %v2383_v15 = vmul.f32 0.5, %v2371_v28  ;;  %v2372_v27 = vadd.f32 1.0, %v3621_v31  ;;  %v2394_v56 = vmul.f32 %v2382_v42, %v4292_v13 }
 0x922   : > { %v2385_v16 = vmul.f32 0.5, %v2373_v34  ;;  %v2374_v41 = vadd.f32 1.0, %v3623_v3 }
 0x923   : > { %v2384_v20 = vmul.f32 0.5, %v2372_v27  ;;  %v2395_v40 = vmul.f32 %v2383_v15, %v4300_v57 }
 0x924   : > { %v2386_v8 = vmul.f32 0.5, %v2374_v41  ;;  %v2397_v50 = vmul.f32 %v2385_v16, %v4303_v59 }
 0x925   : > { %v3625_v43 = vpop.eup %3624  ;;  %v2396_v53 = vmul.f32 %v2384_v20, %v4312_v5  ;;  %v2403_v57 = vpack.c.bf16 %v2395_v40, %v2391_v54 }
 0x926   : > { %v2398_v12 = vmul.f32 %v2386_v8, %v4315_v44  ;;  %v2375_v61 = vadd.f32 1.0, %v3625_v43  ;;  %v2405_v60 = vpack.c.bf16 %v2397_v50, %v2393_v63 }
 0x927   : > { %v3627_v58 = vpop.eup %3626  ;;  %v2404_v62 = vpack.c.bf16 %v2396_v53, %v2392_v35 }
 0x928   : > { %v2406_v47 = vpack.c.bf16 %v2398_v12, %v2394_v56  ;;  %v2377_v29 = vadd.f32 1.0, %v3627_v58  ;;  %v2387_v7 = vmul.f32 0.5, %v2375_v61 }
 0x929   : > { %2706 = vmatprep.mubr.bf16.mxu1 %v2404_v62 }
 0x92a   : > { %v3629_v59 = vpop.eup %3628  ;;  %2754 = vmatprep.mubr.bf16.mxu0 %v2406_v47  ;;  %2707 = vmatmul.mubr.bf16.vlgmr.msra.gmra.mxu1 %v2403_v57  ;;  %v2389_v13 = vmul.f32 0.5, %v2377_v29  ;;  %v2399_v52 = vmul.f32 %v2387_v7, %v4329_v33  ;;  %v3076_v33 = vld [vmem:[%s645_s30] ss:$0 sm:$0xff] }
 0x92b   : > { %v3631_v5 = vpop.eup %3630  ;;  %2755 = vmatmul.mubr.bf16.vlgmr.msra.gmra.mxu0 %v2405_v60  ;;  %v2376_v49 = vadd.f32 1.0, %v3629_v59 }
 0x92c   : > { %v2378_v48 = vadd.f32 1.0, %v3631_v5  ;;  %v2401_v37 = vmul.f32 %v2389_v13, %v4336_v32  ;;  %v2407_v4 = vpack.c.bf16 %v2399_v52, %v2399_v52 }
 0x92d   : > { %v2388_v44 = vmul.f32 0.5, %v2376_v49 }
 0x92e   : > { %v2390_v0 = vmul.f32 0.5, %v2378_v48  ;;  %v2409_v10 = vpack.c.bf16 %v2401_v37, %v2401_v37 }
 0x92f   : > { %v2400_v2 = vmul.f32 %v2388_v44, %v4344_v55 }
 0x930   : > { %v2402_v46 = vmul.f32 %v2390_v0, %v4347_v45 }
 0x931   : > { %v2408_v38 = vpack.c.bf16 %v2400_v2, %v2400_v2 }
 0x932   : > { %v2410_v9 = vpack.c.bf16 %v2402_v46, %v2402_v46 }
 0x933   : > { %2714 = vmatprep.mubr.bf16.mxu1 %v2408_v38 }
 0x934   : > { %2762 = vmatprep.mubr.bf16.mxu0 %v2410_v9  ;;  %2715 = vmatmul.mubr.bf16.gmra.mxu1 %v2407_v4 }
 0x935   : > { %2763 = vmatmul.mubr.bf16.gmra.mxu0 %v2409_v10 }
 0x9ea   : > { %v3183_v11 = vpop.f32.mrf.mxu1 }
 0x9eb   : > { %v3211_v17 = vpop.f32.mrf.mxu0 }
 0x9ec   : > { %v3184_v55 = vpop.f32.mrf.mxu1 }
 0x9ed   : > { %v3185_v14 = vadd.f32 %v3184_v55, %v3183_v11  ;;  %v3212_v32 = vpop.f32.mrf.mxu0 }
 0x9ee   : > { %v3186_v18 = vpop.f32.mrf.mxu1  ;;  %v3213_v19 = vadd.f32 %v3212_v32, %v3211_v17 }
 0x9ef   : > { %v2709_v45 = vadd.f32 %v3185_v14, %v3076_v33  ;;  %v3214_v21 = vpop.f32.mrf.mxu0 }
 0x9f0   : > { %v3187_v23 = vpop.f32.mrf.mxu1 }
 0x9f1   : > { %v2757_v25 = vadd.f32 %v3213_v19, %v2709_v45  ;;  %v3188_v22 = vadd.f32 %v3187_v23, %v3186_v18  ;;  %v3215_v26 = vpop.f32.mrf.mxu0 }
 0x9f2   : > { %v3216_v31 = vadd.f32 %v3215_v26, %v3214_v21 }
 0x9f3   : > { %v2770_v24 = vadd.f32 %v2757_v25, %v4160_v1  ;;  %v2712_v28 = vadd.f32 %v3188_v22, %v3076_v33 }
 0x9f4   : > { %v3189_v34 = vpop.f32.mrf.mxu1 }
 0x9f5   : > { %2773 = vst [vmem:[#allocation2 + $0x10] sm:$0xff] %v2770_v24  ;;  %v2760_v3 = vadd.f32 %v3216_v31, %v2712_v28  ;;  %v3217_v15 = vpop.f32.mrf.mxu0 }
 0x9f6   : > { %v3190_v27 = vpop.f32.mrf.mxu1 }
 0x9f7   : > { %v2771_v30 = vadd.f32 %v2760_v3, %v4163_v51  ;;  %v3191_v39 = vadd.f32 %v3190_v27, %v3189_v34  ;;  %v3218_v16 = vpop.f32.mrf.mxu0 }
 0x9f8   : > { %v3192_v41 = vpop.f32.mrf.mxu1  ;;  %v3219_v6 = vadd.f32 %v3218_v16, %v3217_v15 }
 0x9f9   : > { %2774 = vst [vmem:[#allocation2] sm:$0xff] %v2771_v30  ;;  %v2717_v42 = vadd.f32 %v3191_v39, %v3076_v33  ;;  %v3220_v20 = vpop.f32.mrf.mxu0 }
 0x9fa   : > { %v3193_v40 = vpop.f32.mrf.mxu1 }
 0x9fb   : > { %v2765_v8 = vadd.f32 %v3219_v6, %v2717_v42  ;;  %v3221_v43 = vpop.f32.mrf.mxu0  ;;  %2779 = sbr.rel (%p3109_p8) target bundleno = 2562 (0xa02), region = 80 }
 0x9fd   : > { %v2772_v1 = vadd.f32 %v2765_v8, %v4165_v36 }
 0x9ff   : > { %2775 = vst [vmem:[#allocation2 + $0x8] sm:$0x1] %v2772_v1 }
 0xa00   : > { %2780 = vst [vmem:[%s3851_s5] sm:$0xff] %v2770_v24  ;;  %2781 = vst [vmem:[%s3851_s5 + $0x8] sm:$0xff] %v2771_v30 }
 0xa01   : > { %2782 = vst [vmem:[%s3851_s5 + $0x10] sm:$0x1] %v2772_v1 }
 0xa02 PF: > { %s4443_s30 = sld [smem:[#allocation6_spill]] }
 0xa03   : > { %s4444_s25 = sld [smem:[#allocation4_spill]] }
 0xa04   : > { %s4445_s26 = sld [smem:[#allocation5_spill]] }
 0xa05   : > { %s4446_s27 = sld [smem:[#allocation7_spill]] }
 0xa06   : > { %s4447_s28 = sld [smem:[#allocation8_spill]] }
 0xa08   : > { %s23_s29 = sadd.s32 1, %s4443_s30  }
 0xa09   : > { %p20_p9 = scmp.ge.s32.totalorder %s23_s29, 6  }
 0xa0b   :  { %22 = sbr.rel (!%p20_p9) target bundleno = 7 (0x7), region = 146 }

</bundles_post_ra>
